<compile_context>
chip_gen: v7x
topology: tpu7x:2x2x1
jax: 0.10.0
libtpu: 0.0.40
codegen_flags: <defaults>
</compile_context>

<pallas_src>
import functools

import jax
import jax.numpy as jnp
from jax.experimental import pallas as pl
from jax.experimental.pallas import tpu as pltpu

# Layer sizes of PolicyNet: 2 -> 16 -> 32 -> 16 -> 4
LAYER_DIMS = ((2, 16), (16, 32), (32, 16), (16, 4))
N_LAYERS = len(LAYER_DIMS)
PAD = 32            # every layer dim fits inside a (PAD, PAD) slab
N_OBS = 2
N_ACTIONS = 4
LANE = 128


def _round_up(n, m):
    return ((n + m - 1) // m) * m


def _dense_vpu(w_ref, b_ref, layer, n_out, n_in, h, *, relu):
    """y = W @ h + b on the VPU via unrolled broadcast-multiply-adds.

    w_ref : (N_LAYERS, PAD, PAD) weight slab; layer l weight at [l, :out, :in]
    b_ref : (PAD, N_LAYERS)      bias slab;   layer l bias   at [:out, l]
    h     : (n_in, TILE_B) activations, batch on the 128-lane axis.
    """
    w = w_ref[layer, :n_out, :n_in]          # (n_out, n_in)  static slice
    b = b_ref[:n_out, layer:layer + 1]       # (n_out, 1)
    acc = w[:, 0:1] * h[0:1, :]              # (n_out, TILE_B)
    for i in range(1, n_in):                 # unrolled at trace time (<=32 terms)
        acc = acc + w[:, i:i + 1] * h[i:i + 1, :]
    acc = acc + b
    return jnp.maximum(acc, 0.0) if relu else acc


def policy_kernel(x_ref, w_ref, b_ref, o_ref):
    # x_ref: (N_OBS, TILE_B) -- batch on lanes, so vregs and stores are lane-dense.
    h = x_ref[...]
    h = _dense_vpu(w_ref, b_ref, 0, 16, 2,  h, relu=True)    # fc1 + relu
    h = _dense_vpu(w_ref, b_ref, 1, 32, 16, h, relu=True)    # fca + relu
    h = _dense_vpu(w_ref, b_ref, 2, 16, 32, h, relu=True)    # fcb + relu
    logits = _dense_vpu(w_ref, b_ref, 3, 4, 16, h, relu=False)  # fc2

    # softmax over the action axis (axis 0 in this layout), numerically stable
    m = jnp.max(logits, axis=0, keepdims=True)
    e = jnp.exp(logits - m)
    denom = jnp.sum(e, axis=0, keepdims=True)
    o_ref[...] = e * pl.reciprocal(denom, approx=False)   # divide on the EUP slot


@functools.partial(jax.jit, static_argnames=("tile_b",))
def policy_net_forward(x, w_slab, b_slab, *, tile_b=512):
    """PolicyNet forward. x: (B, 2) f32 -> (B, 4) softmax probabilities."""
    B = x.shape[0]
    # Lane-dense batch tile: large for amortization, but no bigger than needed.
    tile_b = min(tile_b, _round_up(max(B, 1), LANE))
    b_pad = _round_up(B, tile_b)
    grid = (b_pad // tile_b,)

    # Transpose once in the wrapper so batch sits on the 128-lane axis; pad
    # with zeros (softmax of the padded columns is finite and discarded).
    x_t = jnp.zeros((N_OBS, b_pad), jnp.float32).at[:, :B].set(x.T)

    out_t = pl.pallas_call(
        policy_kernel,
        out_shape=jax.ShapeDtypeStruct((N_ACTIONS, b_pad), jnp.float32),
        grid=grid,
        in_specs=[
            pl.BlockSpec((N_OBS, tile_b), lambda i: (0, i)),          # x tile
            pl.BlockSpec((N_LAYERS, PAD, PAD), lambda i: (0, 0, 0)),  # weights (resident)
            pl.BlockSpec((PAD, N_LAYERS), lambda i: (0, 0)),          # biases  (resident)
        ],
        out_specs=pl.BlockSpec((N_ACTIONS, tile_b), lambda i: (0, i)),
        compiler_params=pltpu.CompilerParams(
            dimension_semantics=("parallel",)),   # batch grid -> both TCs on v7x
    )(x_t, w_slab, b_slab)

    return out_t[:, :B].T


def init_params(key):
    """Deterministic init mimicking nn.Linear default U(+-1/sqrt(fan_in)).
    Weights keep PyTorch's (out_features, in_features) convention."""
    params = []
    for fan_in, fan_out in LAYER_DIMS:
        key, kw, kb = jax.random.split(key, 3)
        bound = 1.0 / jnp.sqrt(fan_in)
        w = jax.random.uniform(kw, (fan_out, fan_in), jnp.float32, -bound, bound)
        b = jax.random.uniform(kb, (fan_out,), jnp.float32, -bound, bound)
        params.append((w, b))
    return params


def pack_params(params):
    """Pack the 8 tiny tensors into 2 padded slabs (fewer, larger DMAs)."""
    w_slab = jnp.zeros((N_LAYERS, PAD, PAD), jnp.float32)
    b_slab = jnp.zeros((PAD, N_LAYERS), jnp.float32)
    for l, (w, b) in enumerate(params):
        o, i = w.shape
        w_slab = w_slab.at[l, :o, :i].set(w)
        b_slab = b_slab.at[:o, l].set(b)
    return w_slab, b_slab


def reference_forward(x, params):
    hi = jax.lax.Precision.HIGHEST
    h = x
    for idx, (w, b) in enumerate(params):
        h = jnp.dot(h, w.T, precision=hi) + b
        if idx < N_LAYERS - 1:
            h = jax.nn.relu(h)
    return jax.nn.softmax(h, axis=1)


if __name__ == "__main__":
    key = jax.random.PRNGKey(0)
    kx, kp = jax.random.split(key)
    B = 8  # small demo batch: 2 observation features -> 4 action probabilities
    x = jax.random.normal(kx, (B, N_OBS), jnp.float32)
    params = init_params(kp)
    w_slab, b_slab = pack_params(params)

    out = policy_net_forward(x, w_slab, b_slab)
    out = jax.block_until_ready(out)

    ref = reference_forward(x, params)
    assert out.shape == (B, N_ACTIONS)
    assert jnp.allclose(out, ref, atol=1e-5, rtol=1e-5), \
        float(jnp.max(jnp.abs(out - ref)))
    assert jnp.allclose(jnp.sum(out, axis=1), jnp.ones((B,)), atol=1e-5)

    print("KERNEL_OK")
</pallas_src>

<mosaic_0001>
module attributes {stable_mosaic.version = 11 : i64} {
  func.func @policy_kernel(%arg0: i32, %arg1: memref<2x128xf32, #tpu.memory_space<vmem>>, %arg2: memref<4x32x32xf32, #tpu.memory_space<vmem>>, %arg3: memref<32x4xf32, #tpu.memory_space<vmem>>, %arg4: memref<4x128xf32, #tpu.memory_space<vmem>>) attributes {dimension_semantics = [#tpu.dimension_semantics<parallel>], iteration_bounds = array<i64: 1>, scalar_prefetch = 0 : i64, scratch_operands = 0 : i64, tpu.core_type = #tpu.core_type<tc>, window_params = [{transform_indices = @transform_0, window_bounds = array<i64: 2, 128>}, {pipeline_mode = #tpu.pipeline_mode<synchronous>, transform_indices = @transform_1, window_bounds = array<i64: 4, 32, 32>}, {pipeline_mode = #tpu.pipeline_mode<synchronous>, transform_indices = @transform_2, window_bounds = array<i64: 32, 4>}, {transform_indices = @transform_3, window_bounds = array<i64: 4, 128>}]} {
    %c0 = arith.constant 0 : index
    %c0_0 = arith.constant 0 : index
    %0 = vector.load %arg1[%c0, %c0_0] : memref<2x128xf32, #tpu.memory_space<vmem>>, vector<2x128xf32>
    %c0_1 = arith.constant 0 : index
    %c0_2 = arith.constant 0 : index
    %c0_3 = arith.constant 0 : index
    %1 = vector.load %arg2[%c0_1, %c0_2, %c0_3] : memref<4x32x32xf32, #tpu.memory_space<vmem>>, vector<1x16x2xf32>
    %2 = vector.shape_cast %1 : vector<1x16x2xf32> to vector<16x2xf32>
    %c0_4 = arith.constant 0 : index
    %c0_5 = arith.constant 0 : index
    %3 = vector.load %arg3[%c0_4, %c0_5] : memref<32x4xf32, #tpu.memory_space<vmem>>, vector<16x1xf32>
    %4 = vector.extract_strided_slice %2 {offsets = [0, 0], sizes = [16, 1], strides = [1, 1]} : vector<16x2xf32> to vector<16x1xf32>
    %5 = vector.extract_strided_slice %0 {offsets = [0, 0], sizes = [1, 128], strides = [1, 1]} : vector<2x128xf32> to vector<1x128xf32>
    %6 = vector.broadcast %4 : vector<16x1xf32> to vector<16x128xf32>
    %7 = vector.broadcast %5 : vector<1x128xf32> to vector<16x128xf32>
    %8 = arith.mulf %6, %7 : vector<16x128xf32>
    %9 = vector.extract_strided_slice %2 {offsets = [0, 1], sizes = [16, 1], strides = [1, 1]} : vector<16x2xf32> to vector<16x1xf32>
    %10 = vector.extract_strided_slice %0 {offsets = [1, 0], sizes = [1, 128], strides = [1, 1]} : vector<2x128xf32> to vector<1x128xf32>
    %11 = vector.broadcast %9 : vector<16x1xf32> to vector<16x128xf32>
    %12 = vector.broadcast %10 : vector<1x128xf32> to vector<16x128xf32>
    %13 = arith.mulf %11, %12 : vector<16x128xf32>
    %14 = arith.addf %8, %13 : vector<16x128xf32>
    %15 = vector.broadcast %3 : vector<16x1xf32> to vector<16x128xf32>
    %16 = arith.addf %14, %15 : vector<16x128xf32>
    %cst = arith.constant 0.000000e+00 : f32
    %17 = vector.broadcast %cst : f32 to vector<16x128xf32>
    %18 = arith.maximumf %16, %17 : vector<16x128xf32>
    %c1 = arith.constant 1 : index
    %c0_6 = arith.constant 0 : index
    %c0_7 = arith.constant 0 : index
    %19 = vector.load %arg2[%c1, %c0_6, %c0_7] : memref<4x32x32xf32, #tpu.memory_space<vmem>>, vector<1x32x16xf32>
    %20 = vector.shape_cast %19 : vector<1x32x16xf32> to vector<32x16xf32>
    %c0_8 = arith.constant 0 : index
    %c1_9 = arith.constant 1 : index
    %21 = vector.load %arg3[%c0_8, %c1_9] : memref<32x4xf32, #tpu.memory_space<vmem>>, vector<32x1xf32>
    %22 = vector.extract_strided_slice %20 {offsets = [0, 0], sizes = [32, 1], strides = [1, 1]} : vector<32x16xf32> to vector<32x1xf32>
    %23 = vector.extract_strided_slice %18 {offsets = [0, 0], sizes = [1, 128], strides = [1, 1]} : vector<16x128xf32> to vector<1x128xf32>
    %24 = vector.broadcast %22 : vector<32x1xf32> to vector<32x128xf32>
    %25 = vector.broadcast %23 : vector<1x128xf32> to vector<32x128xf32>
    %26 = arith.mulf %24, %25 : vector<32x128xf32>
    %27 = vector.extract_strided_slice %20 {offsets = [0, 1], sizes = [32, 1], strides = [1, 1]} : vector<32x16xf32> to vector<32x1xf32>
    %28 = vector.extract_strided_slice %18 {offsets = [1, 0], sizes = [1, 128], strides = [1, 1]} : vector<16x128xf32> to vector<1x128xf32>
    %29 = vector.broadcast %27 : vector<32x1xf32> to vector<32x128xf32>
    %30 = vector.broadcast %28 : vector<1x128xf32> to vector<32x128xf32>
    %31 = arith.mulf %29, %30 : vector<32x128xf32>
    %32 = arith.addf %26, %31 : vector<32x128xf32>
    %33 = vector.extract_strided_slice %20 {offsets = [0, 2], sizes = [32, 1], strides = [1, 1]} : vector<32x16xf32> to vector<32x1xf32>
    %34 = vector.extract_strided_slice %18 {offsets = [2, 0], sizes = [1, 128], strides = [1, 1]} : vector<16x128xf32> to vector<1x128xf32>
    %35 = vector.broadcast %33 : vector<32x1xf32> to vector<32x128xf32>
    %36 = vector.broadcast %34 : vector<1x128xf32> to vector<32x128xf32>
    %37 = arith.mulf %35, %36 : vector<32x128xf32>
    %38 = arith.addf %32, %37 : vector<32x128xf32>
    %39 = vector.extract_strided_slice %20 {offsets = [0, 3], sizes = [32, 1], strides = [1, 1]} : vector<32x16xf32> to vector<32x1xf32>
    %40 = vector.extract_strided_slice %18 {offsets = [3, 0], sizes = [1, 128], strides = [1, 1]} : vector<16x128xf32> to vector<1x128xf32>
    %41 = vector.broadcast %39 : vector<32x1xf32> to vector<32x128xf32>
    %42 = vector.broadcast %40 : vector<1x128xf32> to vector<32x128xf32>
    %43 = arith.mulf %41, %42 : vector<32x128xf32>
    %44 = arith.addf %38, %43 : vector<32x128xf32>
    %45 = vector.extract_strided_slice %20 {offsets = [0, 4], sizes = [32, 1], strides = [1, 1]} : vector<32x16xf32> to vector<32x1xf32>
    %46 = vector.extract_strided_slice %18 {offsets = [4, 0], sizes = [1, 128], strides = [1, 1]} : vector<16x128xf32> to vector<1x128xf32>
    %47 = vector.broadcast %45 : vector<32x1xf32> to vector<32x128xf32>
    %48 = vector.broadcast %46 : vector<1x128xf32> to vector<32x128xf32>
    %49 = arith.mulf %47, %48 : vector<32x128xf32>
    %50 = arith.addf %44, %49 : vector<32x128xf32>
    %51 = vector.extract_strided_slice %20 {offsets = [0, 5], sizes = [32, 1], strides = [1, 1]} : vector<32x16xf32> to vector<32x1xf32>
    %52 = vector.extract_strided_slice %18 {offsets = [5, 0], sizes = [1, 128], strides = [1, 1]} : vector<16x128xf32> to vector<1x128xf32>
    %53 = vector.broadcast %51 : vector<32x1xf32> to vector<32x128xf32>
    %54 = vector.broadcast %52 : vector<1x128xf32> to vector<32x128xf32>
    %55 = arith.mulf %53, %54 : vector<32x128xf32>
    %56 = arith.addf %50, %55 : vector<32x128xf32>
    %57 = vector.extract_strided_slice %20 {offsets = [0, 6], sizes = [32, 1], strides = [1, 1]} : vector<32x16xf32> to vector<32x1xf32>
    %58 = vector.extract_strided_slice %18 {offsets = [6, 0], sizes = [1, 128], strides = [1, 1]} : vector<16x128xf32> to vector<1x128xf32>
    %59 = vector.broadcast %57 : vector<32x1xf32> to vector<32x128xf32>
    %60 = vector.broadcast %58 : vector<1x128xf32> to vector<32x128xf32>
    %61 = arith.mulf %59, %60 : vector<32x128xf32>
    %62 = arith.addf %56, %61 : vector<32x128xf32>
    %63 = vector.extract_strided_slice %20 {offsets = [0, 7], sizes = [32, 1], strides = [1, 1]} : vector<32x16xf32> to vector<32x1xf32>
    %64 = vector.extract_strided_slice %18 {offsets = [7, 0], sizes = [1, 128], strides = [1, 1]} : vector<16x128xf32> to vector<1x128xf32>
    %65 = vector.broadcast %63 : vector<32x1xf32> to vector<32x128xf32>
    %66 = vector.broadcast %64 : vector<1x128xf32> to vector<32x128xf32>
    %67 = arith.mulf %65, %66 : vector<32x128xf32>
    %68 = arith.addf %62, %67 : vector<32x128xf32>
    %69 = vector.extract_strided_slice %20 {offsets = [0, 8], sizes = [32, 1], strides = [1, 1]} : vector<32x16xf32> to vector<32x1xf32>
    %70 = vector.extract_strided_slice %18 {offsets = [8, 0], sizes = [1, 128], strides = [1, 1]} : vector<16x128xf32> to vector<1x128xf32>
    %71 = vector.broadcast %69 : vector<32x1xf32> to vector<32x128xf32>
    %72 = vector.broadcast %70 : vector<1x128xf32> to vector<32x128xf32>
    %73 = arith.mulf %71, %72 : vector<32x128xf32>
    %74 = arith.addf %68, %73 : vector<32x128xf32>
    %75 = vector.extract_strided_slice %20 {offsets = [0, 9], sizes = [32, 1], strides = [1, 1]} : vector<32x16xf32> to vector<32x1xf32>
    %76 = vector.extract_strided_slice %18 {offsets = [9, 0], sizes = [1, 128], strides = [1, 1]} : vector<16x128xf32> to vector<1x128xf32>
    %77 = vector.broadcast %75 : vector<32x1xf32> to vector<32x128xf32>
    %78 = vector.broadcast %76 : vector<1x128xf32> to vector<32x128xf32>
    %79 = arith.mulf %77, %78 : vector<32x128xf32>
    %80 = arith.addf %74, %79 : vector<32x128xf32>
    %81 = vector.extract_strided_slice %20 {offsets = [0, 10], sizes = [32, 1], strides = [1, 1]} : vector<32x16xf32> to vector<32x1xf32>
    %82 = vector.extract_strided_slice %18 {offsets = [10, 0], sizes = [1, 128], strides = [1, 1]} : vector<16x128xf32> to vector<1x128xf32>
    %83 = vector.broadcast %81 : vector<32x1xf32> to vector<32x128xf32>
    %84 = vector.broadcast %82 : vector<1x128xf32> to vector<32x128xf32>
    %85 = arith.mulf %83, %84 : vector<32x128xf32>
    %86 = arith.addf %80, %85 : vector<32x128xf32>
    %87 = vector.extract_strided_slice %20 {offsets = [0, 11], sizes = [32, 1], strides = [1, 1]} : vector<32x16xf32> to vector<32x1xf32>
    %88 = vector.extract_strided_slice %18 {offsets = [11, 0], sizes = [1, 128], strides = [1, 1]} : vector<16x128xf32> to vector<1x128xf32>
    %89 = vector.broadcast %87 : vector<32x1xf32> to vector<32x128xf32>
    %90 = vector.broadcast %88 : vector<1x128xf32> to vector<32x128xf32>
    %91 = arith.mulf %89, %90 : vector<32x128xf32>
    %92 = arith.addf %86, %91 : vector<32x128xf32>
    %93 = vector.extract_strided_slice %20 {offsets = [0, 12], sizes = [32, 1], strides = [1, 1]} : vector<32x16xf32> to vector<32x1xf32>
    %94 = vector.extract_strided_slice %18 {offsets = [12, 0], sizes = [1, 128], strides = [1, 1]} : vector<16x128xf32> to vector<1x128xf32>
    %95 = vector.broadcast %93 : vector<32x1xf32> to vector<32x128xf32>
    %96 = vector.broadcast %94 : vector<1x128xf32> to vector<32x128xf32>
    %97 = arith.mulf %95, %96 : vector<32x128xf32>
    %98 = arith.addf %92, %97 : vector<32x128xf32>
    %99 = vector.extract_strided_slice %20 {offsets = [0, 13], sizes = [32, 1], strides = [1, 1]} : vector<32x16xf32> to vector<32x1xf32>
    %100 = vector.extract_strided_slice %18 {offsets = [13, 0], sizes = [1, 128], strides = [1, 1]} : vector<16x128xf32> to vector<1x128xf32>
    %101 = vector.broadcast %99 : vector<32x1xf32> to vector<32x128xf32>
    %102 = vector.broadcast %100 : vector<1x128xf32> to vector<32x128xf32>
    %103 = arith.mulf %101, %102 : vector<32x128xf32>
    %104 = arith.addf %98, %103 : vector<32x128xf32>
    %105 = vector.extract_strided_slice %20 {offsets = [0, 14], sizes = [32, 1], strides = [1, 1]} : vector<32x16xf32> to vector<32x1xf32>
    %106 = vector.extract_strided_slice %18 {offsets = [14, 0], sizes = [1, 128], strides = [1, 1]} : vector<16x128xf32> to vector<1x128xf32>
    %107 = vector.broadcast %105 : vector<32x1xf32> to vector<32x128xf32>
    %108 = vector.broadcast %106 : vector<1x128xf32> to vector<32x128xf32>
    %109 = arith.mulf %107, %108 : vector<32x128xf32>
    %110 = arith.addf %104, %109 : vector<32x128xf32>
    %111 = vector.extract_strided_slice %20 {offsets = [0, 15], sizes = [32, 1], strides = [1, 1]} : vector<32x16xf32> to vector<32x1xf32>
    %112 = vector.extract_strided_slice %18 {offsets = [15, 0], sizes = [1, 128], strides = [1, 1]} : vector<16x128xf32> to vector<1x128xf32>
    %113 = vector.broadcast %111 : vector<32x1xf32> to vector<32x128xf32>
    %114 = vector.broadcast %112 : vector<1x128xf32> to vector<32x128xf32>
    %115 = arith.mulf %113, %114 : vector<32x128xf32>
    %116 = arith.addf %110, %115 : vector<32x128xf32>
    %117 = vector.broadcast %21 : vector<32x1xf32> to vector<32x128xf32>
    %118 = arith.addf %116, %117 : vector<32x128xf32>
    %cst_10 = arith.constant 0.000000e+00 : f32
    %119 = vector.broadcast %cst_10 : f32 to vector<32x128xf32>
    %120 = arith.maximumf %118, %119 : vector<32x128xf32>
    %c2 = arith.constant 2 : index
    %c0_11 = arith.constant 0 : index
    %c0_12 = arith.constant 0 : index
    %121 = vector.load %arg2[%c2, %c0_11, %c0_12] : memref<4x32x32xf32, #tpu.memory_space<vmem>>, vector<1x16x32xf32>
    %122 = vector.shape_cast %121 : vector<1x16x32xf32> to vector<16x32xf32>
    %c0_13 = arith.constant 0 : index
    %c2_14 = arith.constant 2 : index
    %123 = vector.load %arg3[%c0_13, %c2_14] : memref<32x4xf32, #tpu.memory_space<vmem>>, vector<16x1xf32>
    %124 = vector.extract_strided_slice %122 {offsets = [0, 0], sizes = [16, 1], strides = [1, 1]} : vector<16x32xf32> to vector<16x1xf32>
    %125 = vector.extract_strided_slice %120 {offsets = [0, 0], sizes = [1, 128], strides = [1, 1]} : vector<32x128xf32> to vector<1x128xf32>
    %126 = vector.broadcast %124 : vector<16x1xf32> to vector<16x128xf32>
    %127 = vector.broadcast %125 : vector<1x128xf32> to vector<16x128xf32>
    %128 = arith.mulf %126, %127 : vector<16x128xf32>
    %129 = vector.extract_strided_slice %122 {offsets = [0, 1], sizes = [16, 1], strides = [1, 1]} : vector<16x32xf32> to vector<16x1xf32>
    %130 = vector.extract_strided_slice %120 {offsets = [1, 0], sizes = [1, 128], strides = [1, 1]} : vector<32x128xf32> to vector<1x128xf32>
    %131 = vector.broadcast %129 : vector<16x1xf32> to vector<16x128xf32>
    %132 = vector.broadcast %130 : vector<1x128xf32> to vector<16x128xf32>
    %133 = arith.mulf %131, %132 : vector<16x128xf32>
    %134 = arith.addf %128, %133 : vector<16x128xf32>
    %135 = vector.extract_strided_slice %122 {offsets = [0, 2], sizes = [16, 1], strides = [1, 1]} : vector<16x32xf32> to vector<16x1xf32>
    %136 = vector.extract_strided_slice %120 {offsets = [2, 0], sizes = [1, 128], strides = [1, 1]} : vector<32x128xf32> to vector<1x128xf32>
    %137 = vector.broadcast %135 : vector<16x1xf32> to vector<16x128xf32>
    %138 = vector.broadcast %136 : vector<1x128xf32> to vector<16x128xf32>
    %139 = arith.mulf %137, %138 : vector<16x128xf32>
    %140 = arith.addf %134, %139 : vector<16x128xf32>
    %141 = vector.extract_strided_slice %122 {offsets = [0, 3], sizes = [16, 1], strides = [1, 1]} : vector<16x32xf32> to vector<16x1xf32>
    %142 = vector.extract_strided_slice %120 {offsets = [3, 0], sizes = [1, 128], strides = [1, 1]} : vector<32x128xf32> to vector<1x128xf32>
    %143 = vector.broadcast %141 : vector<16x1xf32> to vector<16x128xf32>
    %144 = vector.broadcast %142 : vector<1x128xf32> to vector<16x128xf32>
    %145 = arith.mulf %143, %144 : vector<16x128xf32>
    %146 = arith.addf %140, %145 : vector<16x128xf32>
    %147 = vector.extract_strided_slice %122 {offsets = [0, 4], sizes = [16, 1], strides = [1, 1]} : vector<16x32xf32> to vector<16x1xf32>
    %148 = vector.extract_strided_slice %120 {offsets = [4, 0], sizes = [1, 128], strides = [1, 1]} : vector<32x128xf32> to vector<1x128xf32>
    %149 = vector.broadcast %147 : vector<16x1xf32> to vector<16x128xf32>
    %150 = vector.broadcast %148 : vector<1x128xf32> to vector<16x128xf32>
    %151 = arith.mulf %149, %150 : vector<16x128xf32>
    %152 = arith.addf %146, %151 : vector<16x128xf32>
    %153 = vector.extract_strided_slice %122 {offsets = [0, 5], sizes = [16, 1], strides = [1, 1]} : vector<16x32xf32> to vector<16x1xf32>
    %154 = vector.extract_strided_slice %120 {offsets = [5, 0], sizes = [1, 128], strides = [1, 1]} : vector<32x128xf32> to vector<1x128xf32>
    %155 = vector.broadcast %153 : vector<16x1xf32> to vector<16x128xf32>
    %156 = vector.broadcast %154 : vector<1x128xf32> to vector<16x128xf32>
    %157 = arith.mulf %155, %156 : vector<16x128xf32>
    %158 = arith.addf %152, %157 : vector<16x128xf32>
    %159 = vector.extract_strided_slice %122 {offsets = [0, 6], sizes = [16, 1], strides = [1, 1]} : vector<16x32xf32> to vector<16x1xf32>
    %160 = vector.extract_strided_slice %120 {offsets = [6, 0], sizes = [1, 128], strides = [1, 1]} : vector<32x128xf32> to vector<1x128xf32>
    %161 = vector.broadcast %159 : vector<16x1xf32> to vector<16x128xf32>
    %162 = vector.broadcast %160 : vector<1x128xf32> to vector<16x128xf32>
    %163 = arith.mulf %161, %162 : vector<16x128xf32>
    %164 = arith.addf %158, %163 : vector<16x128xf32>
    %165 = vector.extract_strided_slice %122 {offsets = [0, 7], sizes = [16, 1], strides = [1, 1]} : vector<16x32xf32> to vector<16x1xf32>
    %166 = vector.extract_strided_slice %120 {offsets = [7, 0], sizes = [1, 128], strides = [1, 1]} : vector<32x128xf32> to vector<1x128xf32>
    %167 = vector.broadcast %165 : vector<16x1xf32> to vector<16x128xf32>
    %168 = vector.broadcast %166 : vector<1x128xf32> to vector<16x128xf32>
    %169 = arith.mulf %167, %168 : vector<16x128xf32>
    %170 = arith.addf %164, %169 : vector<16x128xf32>
    %171 = vector.extract_strided_slice %122 {offsets = [0, 8], sizes = [16, 1], strides = [1, 1]} : vector<16x32xf32> to vector<16x1xf32>
    %172 = vector.extract_strided_slice %120 {offsets = [8, 0], sizes = [1, 128], strides = [1, 1]} : vector<32x128xf32> to vector<1x128xf32>
    %173 = vector.broadcast %171 : vector<16x1xf32> to vector<16x128xf32>
    %174 = vector.broadcast %172 : vector<1x128xf32> to vector<16x128xf32>
    %175 = arith.mulf %173, %174 : vector<16x128xf32>
    %176 = arith.addf %170, %175 : vector<16x128xf32>
    %177 = vector.extract_strided_slice %122 {offsets = [0, 9], sizes = [16, 1], strides = [1, 1]} : vector<16x32xf32> to vector<16x1xf32>
    %178 = vector.extract_strided_slice %120 {offsets = [9, 0], sizes = [1, 128], strides = [1, 1]} : vector<32x128xf32> to vector<1x128xf32>
    %179 = vector.broadcast %177 : vector<16x1xf32> to vector<16x128xf32>
    %180 = vector.broadcast %178 : vector<1x128xf32> to vector<16x128xf32>
    %181 = arith.mulf %179, %180 : vector<16x128xf32>
    %182 = arith.addf %176, %181 : vector<16x128xf32>
    %183 = vector.extract_strided_slice %122 {offsets = [0, 10], sizes = [16, 1], strides = [1, 1]} : vector<16x32xf32> to vector<16x1xf32>
    %184 = vector.extract_strided_slice %120 {offsets = [10, 0], sizes = [1, 128], strides = [1, 1]} : vector<32x128xf32> to vector<1x128xf32>
    %185 = vector.broadcast %183 : vector<16x1xf32> to vector<16x128xf32>
    %186 = vector.broadcast %184 : vector<1x128xf32> to vector<16x128xf32>
    %187 = arith.mulf %185, %186 : vector<16x128xf32>
    %188 = arith.addf %182, %187 : vector<16x128xf32>
    %189 = vector.extract_strided_slice %122 {offsets = [0, 11], sizes = [16, 1], strides = [1, 1]} : vector<16x32xf32> to vector<16x1xf32>
    %190 = vector.extract_strided_slice %120 {offsets = [11, 0], sizes = [1, 128], strides = [1, 1]} : vector<32x128xf32> to vector<1x128xf32>
    %191 = vector.broadcast %189 : vector<16x1xf32> to vector<16x128xf32>
    %192 = vector.broadcast %190 : vector<1x128xf32> to vector<16x128xf32>
    %193 = arith.mulf %191, %192 : vector<16x128xf32>
    %194 = arith.addf %188, %193 : vector<16x128xf32>
    %195 = vector.extract_strided_slice %122 {offsets = [0, 12], sizes = [16, 1], strides = [1, 1]} : vector<16x32xf32> to vector<16x1xf32>
    %196 = vector.extract_strided_slice %120 {offsets = [12, 0], sizes = [1, 128], strides = [1, 1]} : vector<32x128xf32> to vector<1x128xf32>
    %197 = vector.broadcast %195 : vector<16x1xf32> to vector<16x128xf32>
    %198 = vector.broadcast %196 : vector<1x128xf32> to vector<16x128xf32>
    %199 = arith.mulf %197, %198 : vector<16x128xf32>
    %200 = arith.addf %194, %199 : vector<16x128xf32>
    %201 = vector.extract_strided_slice %122 {offsets = [0, 13], sizes = [16, 1], strides = [1, 1]} : vector<16x32xf32> to vector<16x1xf32>
    %202 = vector.extract_strided_slice %120 {offsets = [13, 0], sizes = [1, 128], strides = [1, 1]} : vector<32x128xf32> to vector<1x128xf32>
    %203 = vector.broadcast %201 : vector<16x1xf32> to vector<16x128xf32>
    %204 = vector.broadcast %202 : vector<1x128xf32> to vector<16x128xf32>
    %205 = arith.mulf %203, %204 : vector<16x128xf32>
    %206 = arith.addf %200, %205 : vector<16x128xf32>
    %207 = vector.extract_strided_slice %122 {offsets = [0, 14], sizes = [16, 1], strides = [1, 1]} : vector<16x32xf32> to vector<16x1xf32>
    %208 = vector.extract_strided_slice %120 {offsets = [14, 0], sizes = [1, 128], strides = [1, 1]} : vector<32x128xf32> to vector<1x128xf32>
    %209 = vector.broadcast %207 : vector<16x1xf32> to vector<16x128xf32>
    %210 = vector.broadcast %208 : vector<1x128xf32> to vector<16x128xf32>
    %211 = arith.mulf %209, %210 : vector<16x128xf32>
    %212 = arith.addf %206, %211 : vector<16x128xf32>
    %213 = vector.extract_strided_slice %122 {offsets = [0, 15], sizes = [16, 1], strides = [1, 1]} : vector<16x32xf32> to vector<16x1xf32>
    %214 = vector.extract_strided_slice %120 {offsets = [15, 0], sizes = [1, 128], strides = [1, 1]} : vector<32x128xf32> to vector<1x128xf32>
    %215 = vector.broadcast %213 : vector<16x1xf32> to vector<16x128xf32>
    %216 = vector.broadcast %214 : vector<1x128xf32> to vector<16x128xf32>
    %217 = arith.mulf %215, %216 : vector<16x128xf32>
    %218 = arith.addf %212, %217 : vector<16x128xf32>
    %219 = vector.extract_strided_slice %122 {offsets = [0, 16], sizes = [16, 1], strides = [1, 1]} : vector<16x32xf32> to vector<16x1xf32>
    %220 = vector.extract_strided_slice %120 {offsets = [16, 0], sizes = [1, 128], strides = [1, 1]} : vector<32x128xf32> to vector<1x128xf32>
    %221 = vector.broadcast %219 : vector<16x1xf32> to vector<16x128xf32>
    %222 = vector.broadcast %220 : vector<1x128xf32> to vector<16x128xf32>
    %223 = arith.mulf %221, %222 : vector<16x128xf32>
    %224 = arith.addf %218, %223 : vector<16x128xf32>
    %225 = vector.extract_strided_slice %122 {offsets = [0, 17], sizes = [16, 1], strides = [1, 1]} : vector<16x32xf32> to vector<16x1xf32>
    %226 = vector.extract_strided_slice %120 {offsets = [17, 0], sizes = [1, 128], strides = [1, 1]} : vector<32x128xf32> to vector<1x128xf32>
    %227 = vector.broadcast %225 : vector<16x1xf32> to vector<16x128xf32>
    %228 = vector.broadcast %226 : vector<1x128xf32> to vector<16x128xf32>
    %229 = arith.mulf %227, %228 : vector<16x128xf32>
    %230 = arith.addf %224, %229 : vector<16x128xf32>
    %231 = vector.extract_strided_slice %122 {offsets = [0, 18], sizes = [16, 1], strides = [1, 1]} : vector<16x32xf32> to vector<16x1xf32>
    %232 = vector.extract_strided_slice %120 {offsets = [18, 0], sizes = [1, 128], strides = [1, 1]} : vector<32x128xf32> to vector<1x128xf32>
    %233 = vector.broadcast %231 : vector<16x1xf32> to vector<16x128xf32>
    %234 = vector.broadcast %232 : vector<1x128xf32> to vector<16x128xf32>
    %235 = arith.mulf %233, %234 : vector<16x128xf32>
    %236 = arith.addf %230, %235 : vector<16x128xf32>
    %237 = vector.extract_strided_slice %122 {offsets = [0, 19], sizes = [16, 1], strides = [1, 1]} : vector<16x32xf32> to vector<16x1xf32>
    %238 = vector.extract_strided_slice %120 {offsets = [19, 0], sizes = [1, 128], strides = [1, 1]} : vector<32x128xf32> to vector<1x128xf32>
    %239 = vector.broadcast %237 : vector<16x1xf32> to vector<16x128xf32>
    %240 = vector.broadcast %238 : vector<1x128xf32> to vector<16x128xf32>
    %241 = arith.mulf %239, %240 : vector<16x128xf32>
    %242 = arith.addf %236, %241 : vector<16x128xf32>
    %243 = vector.extract_strided_slice %122 {offsets = [0, 20], sizes = [16, 1], strides = [1, 1]} : vector<16x32xf32> to vector<16x1xf32>
    %244 = vector.extract_strided_slice %120 {offsets = [20, 0], sizes = [1, 128], strides = [1, 1]} : vector<32x128xf32> to vector<1x128xf32>
    %245 = vector.broadcast %243 : vector<16x1xf32> to vector<16x128xf32>
    %246 = vector.broadcast %244 : vector<1x128xf32> to vector<16x128xf32>
    %247 = arith.mulf %245, %246 : vector<16x128xf32>
    %248 = arith.addf %242, %247 : vector<16x128xf32>
    %249 = vector.extract_strided_slice %122 {offsets = [0, 21], sizes = [16, 1], strides = [1, 1]} : vector<16x32xf32> to vector<16x1xf32>
    %250 = vector.extract_strided_slice %120 {offsets = [21, 0], sizes = [1, 128], strides = [1, 1]} : vector<32x128xf32> to vector<1x128xf32>
    %251 = vector.broadcast %249 : vector<16x1xf32> to vector<16x128xf32>
    %252 = vector.broadcast %250 : vector<1x128xf32> to vector<16x128xf32>
    %253 = arith.mulf %251, %252 : vector<16x128xf32>
    %254 = arith.addf %248, %253 : vector<16x128xf32>
    %255 = vector.extract_strided_slice %122 {offsets = [0, 22], sizes = [16, 1], strides = [1, 1]} : vector<16x32xf32> to vector<16x1xf32>
    %256 = vector.extract_strided_slice %120 {offsets = [22, 0], sizes = [1, 128], strides = [1, 1]} : vector<32x128xf32> to vector<1x128xf32>
    %257 = vector.broadcast %255 : vector<16x1xf32> to vector<16x128xf32>
    %258 = vector.broadcast %256 : vector<1x128xf32> to vector<16x128xf32>
    %259 = arith.mulf %257, %258 : vector<16x128xf32>
    %260 = arith.addf %254, %259 : vector<16x128xf32>
    %261 = vector.extract_strided_slice %122 {offsets = [0, 23], sizes = [16, 1], strides = [1, 1]} : vector<16x32xf32> to vector<16x1xf32>
    %262 = vector.extract_strided_slice %120 {offsets = [23, 0], sizes = [1, 128], strides = [1, 1]} : vector<32x128xf32> to vector<1x128xf32>
    %263 = vector.broadcast %261 : vector<16x1xf32> to vector<16x128xf32>
    %264 = vector.broadcast %262 : vector<1x128xf32> to vector<16x128xf32>
    %265 = arith.mulf %263, %264 : vector<16x128xf32>
    %266 = arith.addf %260, %265 : vector<16x128xf32>
    %267 = vector.extract_strided_slice %122 {offsets = [0, 24], sizes = [16, 1], strides = [1, 1]} : vector<16x32xf32> to vector<16x1xf32>
    %268 = vector.extract_strided_slice %120 {offsets = [24, 0], sizes = [1, 128], strides = [1, 1]} : vector<32x128xf32> to vector<1x128xf32>
    %269 = vector.broadcast %267 : vector<16x1xf32> to vector<16x128xf32>
    %270 = vector.broadcast %268 : vector<1x128xf32> to vector<16x128xf32>
    %271 = arith.mulf %269, %270 : vector<16x128xf32>
    %272 = arith.addf %266, %271 : vector<16x128xf32>
    %273 = vector.extract_strided_slice %122 {offsets = [0, 25], sizes = [16, 1], strides = [1, 1]} : vector<16x32xf32> to vector<16x1xf32>
    %274 = vector.extract_strided_slice %120 {offsets = [25, 0], sizes = [1, 128], strides = [1, 1]} : vector<32x128xf32> to vector<1x128xf32>
    %275 = vector.broadcast %273 : vector<16x1xf32> to vector<16x128xf32>
    %276 = vector.broadcast %274 : vector<1x128xf32> to vector<16x128xf32>
    %277 = arith.mulf %275, %276 : vector<16x128xf32>
    %278 = arith.addf %272, %277 : vector<16x128xf32>
    %279 = vector.extract_strided_slice %122 {offsets = [0, 26], sizes = [16, 1], strides = [1, 1]} : vector<16x32xf32> to vector<16x1xf32>
    %280 = vector.extract_strided_slice %120 {offsets = [26, 0], sizes = [1, 128], strides = [1, 1]} : vector<32x128xf32> to vector<1x128xf32>
    %281 = vector.broadcast %279 : vector<16x1xf32> to vector<16x128xf32>
    %282 = vector.broadcast %280 : vector<1x128xf32> to vector<16x128xf32>
    %283 = arith.mulf %281, %282 : vector<16x128xf32>
    %284 = arith.addf %278, %283 : vector<16x128xf32>
    %285 = vector.extract_strided_slice %122 {offsets = [0, 27], sizes = [16, 1], strides = [1, 1]} : vector<16x32xf32> to vector<16x1xf32>
    %286 = vector.extract_strided_slice %120 {offsets = [27, 0], sizes = [1, 128], strides = [1, 1]} : vector<32x128xf32> to vector<1x128xf32>
    %287 = vector.broadcast %285 : vector<16x1xf32> to vector<16x128xf32>
    %288 = vector.broadcast %286 : vector<1x128xf32> to vector<16x128xf32>
    %289 = arith.mulf %287, %288 : vector<16x128xf32>
    %290 = arith.addf %284, %289 : vector<16x128xf32>
    %291 = vector.extract_strided_slice %122 {offsets = [0, 28], sizes = [16, 1], strides = [1, 1]} : vector<16x32xf32> to vector<16x1xf32>
    %292 = vector.extract_strided_slice %120 {offsets = [28, 0], sizes = [1, 128], strides = [1, 1]} : vector<32x128xf32> to vector<1x128xf32>
    %293 = vector.broadcast %291 : vector<16x1xf32> to vector<16x128xf32>
    %294 = vector.broadcast %292 : vector<1x128xf32> to vector<16x128xf32>
    %295 = arith.mulf %293, %294 : vector<16x128xf32>
    %296 = arith.addf %290, %295 : vector<16x128xf32>
    %297 = vector.extract_strided_slice %122 {offsets = [0, 29], sizes = [16, 1], strides = [1, 1]} : vector<16x32xf32> to vector<16x1xf32>
    %298 = vector.extract_strided_slice %120 {offsets = [29, 0], sizes = [1, 128], strides = [1, 1]} : vector<32x128xf32> to vector<1x128xf32>
    %299 = vector.broadcast %297 : vector<16x1xf32> to vector<16x128xf32>
    %300 = vector.broadcast %298 : vector<1x128xf32> to vector<16x128xf32>
    %301 = arith.mulf %299, %300 : vector<16x128xf32>
    %302 = arith.addf %296, %301 : vector<16x128xf32>
    %303 = vector.extract_strided_slice %122 {offsets = [0, 30], sizes = [16, 1], strides = [1, 1]} : vector<16x32xf32> to vector<16x1xf32>
    %304 = vector.extract_strided_slice %120 {offsets = [30, 0], sizes = [1, 128], strides = [1, 1]} : vector<32x128xf32> to vector<1x128xf32>
    %305 = vector.broadcast %303 : vector<16x1xf32> to vector<16x128xf32>
    %306 = vector.broadcast %304 : vector<1x128xf32> to vector<16x128xf32>
    %307 = arith.mulf %305, %306 : vector<16x128xf32>
    %308 = arith.addf %302, %307 : vector<16x128xf32>
    %309 = vector.extract_strided_slice %122 {offsets = [0, 31], sizes = [16, 1], strides = [1, 1]} : vector<16x32xf32> to vector<16x1xf32>
    %310 = vector.extract_strided_slice %120 {offsets = [31, 0], sizes = [1, 128], strides = [1, 1]} : vector<32x128xf32> to vector<1x128xf32>
    %311 = vector.broadcast %309 : vector<16x1xf32> to vector<16x128xf32>
    %312 = vector.broadcast %310 : vector<1x128xf32> to vector<16x128xf32>
    %313 = arith.mulf %311, %312 : vector<16x128xf32>
    %314 = arith.addf %308, %313 : vector<16x128xf32>
    %315 = vector.broadcast %123 : vector<16x1xf32> to vector<16x128xf32>
    %316 = arith.addf %314, %315 : vector<16x128xf32>
    %cst_15 = arith.constant 0.000000e+00 : f32
    %317 = vector.broadcast %cst_15 : f32 to vector<16x128xf32>
    %318 = arith.maximumf %316, %317 : vector<16x128xf32>
    %c3 = arith.constant 3 : index
    %c0_16 = arith.constant 0 : index
    %c0_17 = arith.constant 0 : index
    %319 = vector.load %arg2[%c3, %c0_16, %c0_17] : memref<4x32x32xf32, #tpu.memory_space<vmem>>, vector<1x4x16xf32>
    %320 = vector.shape_cast %319 : vector<1x4x16xf32> to vector<4x16xf32>
    %c0_18 = arith.constant 0 : index
    %c3_19 = arith.constant 3 : index
    %321 = vector.load %arg3[%c0_18, %c3_19] : memref<32x4xf32, #tpu.memory_space<vmem>>, vector<4x1xf32>
    %322 = vector.extract_strided_slice %320 {offsets = [0, 0], sizes = [4, 1], strides = [1, 1]} : vector<4x16xf32> to vector<4x1xf32>
    %323 = vector.extract_strided_slice %318 {offsets = [0, 0], sizes = [1, 128], strides = [1, 1]} : vector<16x128xf32> to vector<1x128xf32>
    %324 = vector.broadcast %322 : vector<4x1xf32> to vector<4x128xf32>
    %325 = vector.broadcast %323 : vector<1x128xf32> to vector<4x128xf32>
    %326 = arith.mulf %324, %325 : vector<4x128xf32>
    %327 = vector.extract_strided_slice %320 {offsets = [0, 1], sizes = [4, 1], strides = [1, 1]} : vector<4x16xf32> to vector<4x1xf32>
    %328 = vector.extract_strided_slice %318 {offsets = [1, 0], sizes = [1, 128], strides = [1, 1]} : vector<16x128xf32> to vector<1x128xf32>
    %329 = vector.broadcast %327 : vector<4x1xf32> to vector<4x128xf32>
    %330 = vector.broadcast %328 : vector<1x128xf32> to vector<4x128xf32>
    %331 = arith.mulf %329, %330 : vector<4x128xf32>
    %332 = arith.addf %326, %331 : vector<4x128xf32>
    %333 = vector.extract_strided_slice %320 {offsets = [0, 2], sizes = [4, 1], strides = [1, 1]} : vector<4x16xf32> to vector<4x1xf32>
    %334 = vector.extract_strided_slice %318 {offsets = [2, 0], sizes = [1, 128], strides = [1, 1]} : vector<16x128xf32> to vector<1x128xf32>
    %335 = vector.broadcast %333 : vector<4x1xf32> to vector<4x128xf32>
    %336 = vector.broadcast %334 : vector<1x128xf32> to vector<4x128xf32>
    %337 = arith.mulf %335, %336 : vector<4x128xf32>
    %338 = arith.addf %332, %337 : vector<4x128xf32>
    %339 = vector.extract_strided_slice %320 {offsets = [0, 3], sizes = [4, 1], strides = [1, 1]} : vector<4x16xf32> to vector<4x1xf32>
    %340 = vector.extract_strided_slice %318 {offsets = [3, 0], sizes = [1, 128], strides = [1, 1]} : vector<16x128xf32> to vector<1x128xf32>
    %341 = vector.broadcast %339 : vector<4x1xf32> to vector<4x128xf32>
    %342 = vector.broadcast %340 : vector<1x128xf32> to vector<4x128xf32>
    %343 = arith.mulf %341, %342 : vector<4x128xf32>
    %344 = arith.addf %338, %343 : vector<4x128xf32>
    %345 = vector.extract_strided_slice %320 {offsets = [0, 4], sizes = [4, 1], strides = [1, 1]} : vector<4x16xf32> to vector<4x1xf32>
    %346 = vector.extract_strided_slice %318 {offsets = [4, 0], sizes = [1, 128], strides = [1, 1]} : vector<16x128xf32> to vector<1x128xf32>
    %347 = vector.broadcast %345 : vector<4x1xf32> to vector<4x128xf32>
    %348 = vector.broadcast %346 : vector<1x128xf32> to vector<4x128xf32>
    %349 = arith.mulf %347, %348 : vector<4x128xf32>
    %350 = arith.addf %344, %349 : vector<4x128xf32>
    %351 = vector.extract_strided_slice %320 {offsets = [0, 5], sizes = [4, 1], strides = [1, 1]} : vector<4x16xf32> to vector<4x1xf32>
    %352 = vector.extract_strided_slice %318 {offsets = [5, 0], sizes = [1, 128], strides = [1, 1]} : vector<16x128xf32> to vector<1x128xf32>
    %353 = vector.broadcast %351 : vector<4x1xf32> to vector<4x128xf32>
    %354 = vector.broadcast %352 : vector<1x128xf32> to vector<4x128xf32>
    %355 = arith.mulf %353, %354 : vector<4x128xf32>
    %356 = arith.addf %350, %355 : vector<4x128xf32>
    %357 = vector.extract_strided_slice %320 {offsets = [0, 6], sizes = [4, 1], strides = [1, 1]} : vector<4x16xf32> to vector<4x1xf32>
    %358 = vector.extract_strided_slice %318 {offsets = [6, 0], sizes = [1, 128], strides = [1, 1]} : vector<16x128xf32> to vector<1x128xf32>
    %359 = vector.broadcast %357 : vector<4x1xf32> to vector<4x128xf32>
    %360 = vector.broadcast %358 : vector<1x128xf32> to vector<4x128xf32>
    %361 = arith.mulf %359, %360 : vector<4x128xf32>
    %362 = arith.addf %356, %361 : vector<4x128xf32>
    %363 = vector.extract_strided_slice %320 {offsets = [0, 7], sizes = [4, 1], strides = [1, 1]} : vector<4x16xf32> to vector<4x1xf32>
    %364 = vector.extract_strided_slice %318 {offsets = [7, 0], sizes = [1, 128], strides = [1, 1]} : vector<16x128xf32> to vector<1x128xf32>
    %365 = vector.broadcast %363 : vector<4x1xf32> to vector<4x128xf32>
    %366 = vector.broadcast %364 : vector<1x128xf32> to vector<4x128xf32>
    %367 = arith.mulf %365, %366 : vector<4x128xf32>
    %368 = arith.addf %362, %367 : vector<4x128xf32>
    %369 = vector.extract_strided_slice %320 {offsets = [0, 8], sizes = [4, 1], strides = [1, 1]} : vector<4x16xf32> to vector<4x1xf32>
    %370 = vector.extract_strided_slice %318 {offsets = [8, 0], sizes = [1, 128], strides = [1, 1]} : vector<16x128xf32> to vector<1x128xf32>
    %371 = vector.broadcast %369 : vector<4x1xf32> to vector<4x128xf32>
    %372 = vector.broadcast %370 : vector<1x128xf32> to vector<4x128xf32>
    %373 = arith.mulf %371, %372 : vector<4x128xf32>
    %374 = arith.addf %368, %373 : vector<4x128xf32>
    %375 = vector.extract_strided_slice %320 {offsets = [0, 9], sizes = [4, 1], strides = [1, 1]} : vector<4x16xf32> to vector<4x1xf32>
    %376 = vector.extract_strided_slice %318 {offsets = [9, 0], sizes = [1, 128], strides = [1, 1]} : vector<16x128xf32> to vector<1x128xf32>
    %377 = vector.broadcast %375 : vector<4x1xf32> to vector<4x128xf32>
    %378 = vector.broadcast %376 : vector<1x128xf32> to vector<4x128xf32>
    %379 = arith.mulf %377, %378 : vector<4x128xf32>
    %380 = arith.addf %374, %379 : vector<4x128xf32>
    %381 = vector.extract_strided_slice %320 {offsets = [0, 10], sizes = [4, 1], strides = [1, 1]} : vector<4x16xf32> to vector<4x1xf32>
    %382 = vector.extract_strided_slice %318 {offsets = [10, 0], sizes = [1, 128], strides = [1, 1]} : vector<16x128xf32> to vector<1x128xf32>
    %383 = vector.broadcast %381 : vector<4x1xf32> to vector<4x128xf32>
    %384 = vector.broadcast %382 : vector<1x128xf32> to vector<4x128xf32>
    %385 = arith.mulf %383, %384 : vector<4x128xf32>
    %386 = arith.addf %380, %385 : vector<4x128xf32>
    %387 = vector.extract_strided_slice %320 {offsets = [0, 11], sizes = [4, 1], strides = [1, 1]} : vector<4x16xf32> to vector<4x1xf32>
    %388 = vector.extract_strided_slice %318 {offsets = [11, 0], sizes = [1, 128], strides = [1, 1]} : vector<16x128xf32> to vector<1x128xf32>
    %389 = vector.broadcast %387 : vector<4x1xf32> to vector<4x128xf32>
    %390 = vector.broadcast %388 : vector<1x128xf32> to vector<4x128xf32>
    %391 = arith.mulf %389, %390 : vector<4x128xf32>
    %392 = arith.addf %386, %391 : vector<4x128xf32>
    %393 = vector.extract_strided_slice %320 {offsets = [0, 12], sizes = [4, 1], strides = [1, 1]} : vector<4x16xf32> to vector<4x1xf32>
    %394 = vector.extract_strided_slice %318 {offsets = [12, 0], sizes = [1, 128], strides = [1, 1]} : vector<16x128xf32> to vector<1x128xf32>
    %395 = vector.broadcast %393 : vector<4x1xf32> to vector<4x128xf32>
    %396 = vector.broadcast %394 : vector<1x128xf32> to vector<4x128xf32>
    %397 = arith.mulf %395, %396 : vector<4x128xf32>
    %398 = arith.addf %392, %397 : vector<4x128xf32>
    %399 = vector.extract_strided_slice %320 {offsets = [0, 13], sizes = [4, 1], strides = [1, 1]} : vector<4x16xf32> to vector<4x1xf32>
    %400 = vector.extract_strided_slice %318 {offsets = [13, 0], sizes = [1, 128], strides = [1, 1]} : vector<16x128xf32> to vector<1x128xf32>
    %401 = vector.broadcast %399 : vector<4x1xf32> to vector<4x128xf32>
    %402 = vector.broadcast %400 : vector<1x128xf32> to vector<4x128xf32>
    %403 = arith.mulf %401, %402 : vector<4x128xf32>
    %404 = arith.addf %398, %403 : vector<4x128xf32>
    %405 = vector.extract_strided_slice %320 {offsets = [0, 14], sizes = [4, 1], strides = [1, 1]} : vector<4x16xf32> to vector<4x1xf32>
    %406 = vector.extract_strided_slice %318 {offsets = [14, 0], sizes = [1, 128], strides = [1, 1]} : vector<16x128xf32> to vector<1x128xf32>
    %407 = vector.broadcast %405 : vector<4x1xf32> to vector<4x128xf32>
    %408 = vector.broadcast %406 : vector<1x128xf32> to vector<4x128xf32>
    %409 = arith.mulf %407, %408 : vector<4x128xf32>
    %410 = arith.addf %404, %409 : vector<4x128xf32>
    %411 = vector.extract_strided_slice %320 {offsets = [0, 15], sizes = [4, 1], strides = [1, 1]} : vector<4x16xf32> to vector<4x1xf32>
    %412 = vector.extract_strided_slice %318 {offsets = [15, 0], sizes = [1, 128], strides = [1, 1]} : vector<16x128xf32> to vector<1x128xf32>
    %413 = vector.broadcast %411 : vector<4x1xf32> to vector<4x128xf32>
    %414 = vector.broadcast %412 : vector<1x128xf32> to vector<4x128xf32>
    %415 = arith.mulf %413, %414 : vector<4x128xf32>
    %416 = arith.addf %410, %415 : vector<4x128xf32>
    %417 = vector.broadcast %321 : vector<4x1xf32> to vector<4x128xf32>
    %418 = arith.addf %416, %417 : vector<4x128xf32>
    %cst_20 = arith.constant dense<0xFF800000> : vector<128xf32>
    %419 = vector.multi_reduction <maximumf>, %418, %cst_20 [0] : vector<4x128xf32> to vector<128xf32>
    %420 = vector.shape_cast %419 : vector<128xf32> to vector<1x128xf32>
    %421 = vector.broadcast %420 : vector<1x128xf32> to vector<4x128xf32>
    %422 = arith.subf %418, %421 : vector<4x128xf32>
    %423 = math.exp %422 : vector<4x128xf32>
    %cst_21 = arith.constant dense<0.000000e+00> : vector<128xf32>
    %424 = vector.multi_reduction <add>, %423, %cst_21 [0] : vector<4x128xf32> to vector<128xf32>
    %425 = vector.shape_cast %424 : vector<128xf32> to vector<1x128xf32>
    %426 = tpu.reciprocal %425 : vector<1x128xf32> -> vector<1x128xf32>
    %427 = vector.broadcast %426 : vector<1x128xf32> to vector<4x128xf32>
    %428 = arith.mulf %423, %427 : vector<4x128xf32>
    %c0_22 = arith.constant 0 : index
    %c0_23 = arith.constant 0 : index
    %429 = vector.load %arg4[%c0_22, %c0_23] : memref<4x128xf32, #tpu.memory_space<vmem>>, vector<4x128xf32>
    tpu.vector_store %arg4[%c0_22, %c0_23], %428 {strides = array<i32>} : memref<4x128xf32, #tpu.memory_space<vmem>>, vector<4x128xf32>,
    return
  }
  func.func @transform_0(%arg0: i32) -> (i32, i32) {
    %c0_i32 = arith.constant 0 : i32
    %c0_i32_0 = arith.constant 0 : i32
    return %c0_i32, %arg0 : i32, i32
  }
  func.func @transform_1(%arg0: i32) -> (i32, i32, i32) {
    %c0_i32 = arith.constant 0 : i32
    %c0_i32_0 = arith.constant 0 : i32
    %c0_i32_1 = arith.constant 0 : i32
    %c0_i32_2 = arith.constant 0 : i32
    return %c0_i32, %c0_i32_0, %c0_i32_1 : i32, i32, i32
  }
  func.func @transform_2(%arg0: i32) -> (i32, i32) {
    %c0_i32 = arith.constant 0 : i32
    %c0_i32_0 = arith.constant 0 : i32
    %c0_i32_1 = arith.constant 0 : i32
    return %c0_i32, %c0_i32_0 : i32, i32
  }
  func.func @transform_3(%arg0: i32) -> (i32, i32) {
    %c0_i32 = arith.constant 0 : i32
    %c0_i32_0 = arith.constant 0 : i32
    return %c0_i32, %arg0 : i32, i32
  }
}

</mosaic_0001>

<bundles_post_ra>
// kernel: policy_net_forward.1
= control target key start
LH: loop header
LB: loop body
LE: loop exit
PB: predicated region body
PF: predicated region fallthrough
CT: control target
= control target key end

     0   :  { %8 = vsyncpa [#allocation3], 0  ;;  %s1453_s12 = smov [#allocation2]   ;;  %s2088_s0 = inlined_call_operand.vmem [shape: f32[2,128], index: 0, kind: input, shape index: {}]   ;;  %s2089_s1 = inlined_call_operand.hbm [shape: f32[4,32,32], index: 1, kind: input, shape index: {}]   ;;  %s2090_s2 = inlined_call_operand.vmem [shape: f32[32,4], index: 2, kind: input, shape index: {}]   ;;  %s2091_s3 = inlined_call_operand.vmem [shape: f32[4,128], index: 3, kind: output, shape index: {}]  }
   0x1   :  { %s16_s13 = sshll.u32 %s1453_s12, 4  ;;  %s1429_s16 = scalar_lea.hbm %s2089_s1, 2048  ;;  %s17_s13 = int_to_ptr.vmem [resolvable:$true] %s16_s13 }
   0x2   :  { %p1430_p0 = scmp.ne.s32.totalorder %s2089_s1, %s1429_s16  ;;  %p1433_p1 = scmp.lt.u32.totalorder %s1429_s16, %s2089_s1 }
   0x4   :  { %p1435_p2 = pnand %p1433_p1, %p1430_p0 }
   0x6   :  { %1438 = shalt.err (!%p1435_p2)
}
   0x7   :  { %s1439_s21 = scalar_lea.vmem %s17_s13, 2048  ;;  %p1444_p4 = scmp.lt.s32.totalorder %s17_s13, %s17_s13 }
   0x8   :  { %p1440_p3 = scmp.ne.s32.totalorder %s17_s13, %s1439_s21  ;;  %p1445_p5 = scmp.lt.s32.totalorder %s1439_s21, %s1439_s21 }
   0xa   :  { %p1446_p6 = por %p1445_p5, %p1444_p4 }
   0xc   :  { %p1447_p7 = pnand %p1446_p6, %p1440_p3 }
   0xe   :  { %1450 = shalt.err (!%p1447_p7)
}
   0xf   :  { %s1454_s22 = smov 128   ;;  %s1455_s23 = smov 8  }
  0x10   :  { %22 = dma.hbm_to_vmem [thread:$0]  %s2089_s1, 2048, %s17_s13, [#allocation3], %s1454_s22, %s1454_s22, %s1455_s23  }
  0x11   :  { %1451 = dma.done.wait [#allocation3], 2048  }
  0x12   :  { %1452 = vsyncadd [#allocation3], 4294965248  ;;  %v1456_v0 = vmov 2   ;;  %v2100_v1 = vmov 1   ;;  %v1522_v2 = vld [vmem:[#allocation2 + $0x28] sm:$0xff]  ;;  %v29_v3 = vld [vmem:[#allocation2] sm:$0xff]  ;;  %v43_v34 = vlaneseq }
  0x13   :  { %1325 = vset.pattern.permute.xlu0 %v1456_v0  ;;  %1321 = vset.pattern.permute.xlu1 %v2100_v1  ;;  %v30_v4 = vld [vmem:[#allocation2 + $0x8] sm:$0xff]  ;;  %v1525_v5 = vld [vmem:[#allocation2 + $0x20] sm:$0xff]  ;;  %v1458_v6 = vmov 5   ;;  %v1529_v7 = vld [vmem:[#allocation2 + $0x38] sm:$0xff]  ;;  %v1459_v9 = vmov 0   ;;  %v1460_v10 = vmov 8  }
  0x14   :  { %149 = vperm.xlu0 %1325, %v1522_v2   ;;  %50 = vperm.xlu1 %1321, %v29_v3   ;;  %v32_v8 = vld [vmem:[%s2090_s2 + $0x8] sm:$0xff]  ;;  %v1461_v11 = vmov 11   ;;  %v1545_v12 = vld [vmem:[#allocation2 + $0x30] sm:$0xff]  ;;  %v2097_v13 = vmov 14   ;;  %v1557_v14 = vld [vmem:[%s2090_s2] sm:$0xff]  ;;  %v1463_v15 = vmov 3  }
  0x15   :  { %v1566_v16 = vld [vmem:[#allocation2 + $0x40] sm:$0xff]  ;;  %v1464_v17 = vmov 4   ;;  %v1578_v18 = vld [vmem:[#allocation2 + $0x48] sm:$0xff]  ;;  %v1465_v19 = vmov 6   ;;  %v1466_v20 = vmov 7   ;;  %v1467_v21 = vmov 9  }
  0x16   :  { %v1468_v22 = vmov 10   ;;  %v2106_v29 = vmov 12   ;;  %v2103_v35 = vmov 13   ;;  %v1655_v38 = vshrl.u32 %v43_v34, 7  ;;  %v28_v43 = vld [vmem:[%s2088_s0] sm:$0x3] }
  0x17   :  { %v2101_v48 = vmov 15   ;;  %vm1260_vm0 = vcmask 1043456  }
  0x18   :  { %1328 = vset.pattern.permute.xlu0 %v1458_v6  ;;  %54 = vperm.xlu1 %1321, %v30_v4   ;;  %v1663_v41 = vsub.s32 0, %v1655_v38  ;;  %v1666_v42 = vsub.s32 1, %v1655_v38  ;;  %v1698_v58 = vsub.s32 2, %v1655_v38  ;;  %v1703_v61 = vsub.s32 3, %v1655_v38 }
  0x19   :  { %229 = vperm.xlu0 %1328, %v1525_v5  }
  0x1a   :  { %v1676_v45 = vrot.slane %v28_v43, %v1663_v41  ;;  %v1679_v47 = vrot.slane %v28_v43, %v1666_v42 }
  0x1c   :  { %1322 = vset.pattern.permute.xlu1 %v1459_v9 }
  0x1d   :  { %241 = vperm.xlu0 %1328, %v1529_v7   ;;  %72 = vperm.xlu1 %1322, %v32_v8  }
  0x21   :  { %1333 = vset.pattern.permute.xlu0 %v1460_v10  ;;  %95 = vperm.xlu1 %1322, %v1522_v2  }
  0x22   :  { %317 = vperm.xlu0 %1333, %v1522_v2  }
  0x25   :  { %105 = vperm.xlu1 %1322, %v1529_v7  }
  0x26   :  { %1336 = vset.pattern.permute.xlu0 %v1461_v11 }
  0x27   :  { %397 = vperm.xlu0 %1336, %v1525_v5  }
  0x29   :  { %1323 = vset.pattern.permute.xlu1 %v2100_v1 }
  0x2a   :  { %121 = vperm.xlu1 %1323, %v1522_v2  }
  0x2b   :  { %409 = vperm.xlu0 %1336, %v1529_v7  }
  0x2e   :  { %125 = vperm.xlu1 %1323, %v1545_v12  }
  0x2f   :  { %1341 = vset.pattern.permute.xlu0 %v2097_v13 }
  0x30   :  { %485 = vperm.xlu0 %1341, %v1522_v2  }
  0x32   :  { %1324 = vset.pattern.permute.xlu1 %v1456_v0 }
  0x33   :  { %145 = vperm.xlu1 %1324, %v1525_v5  }
  0x34   :  { %1342 = vset.pattern.permute.xlu0 %v1459_v9 }
  0x35   :  { %35 = vperm.xlu0 %1342, %v29_v3  }
  0x37   :  { %153 = vperm.xlu1 %1324, %v1545_v12  }
  0x39   :  { %40 = vperm.xlu0 %1342, %v30_v4   ;;  %v2092_v4 = vmov 16  }
  0x3b   :  { %157 = vperm.xlu1 %1324, %v1529_v7  }
  0x3d   :  { %67 = vperm.xlu0 %1342, %v1557_v14  }
  0x3f   :  { %1326 = vset.pattern.permute.xlu1 %v1463_v15 }
  0x40   :  { %177 = vperm.xlu1 %1326, %v1522_v2  }
  0x41   :  { %90 = vperm.xlu0 %1342, %v1525_v5  }
  0x44   :  { %181 = vperm.xlu1 %1326, %v1545_v12  }
  0x45   :  { %100 = vperm.xlu0 %1342, %v1545_v12  }
  0x48   :  { %1327 = vset.pattern.permute.xlu1 %v1464_v17 }
  0x49   :  { %569 = vperm.xlu0 %1342, %v1566_v16   ;;  %201 = vperm.xlu1 %1327, %v1525_v5  }
  0x4d   :  { %1345 = vset.pattern.permute.xlu0 %v2100_v1  ;;  %209 = vperm.xlu1 %1327, %v1545_v12  }
  0x4e   :  { %117 = vperm.xlu0 %1345, %v1525_v5  }
  0x51   :  { %213 = vperm.xlu1 %1327, %v1529_v7  }
  0x52   :  { %129 = vperm.xlu0 %1345, %v1529_v7  }
  0x55   :  { %1329 = vset.pattern.permute.xlu1 %v1458_v6 }
  0x56   :  { %543 = vperm.xlu0 %1345, %v32_v8   ;;  %233 = vperm.xlu1 %1329, %v1522_v2  }
  0x5a   :  { %588 = vperm.xlu0 %1345, %v1578_v18   ;;  %237 = vperm.xlu1 %1329, %v1545_v12  }
  0x5e   :  { %1348 = vset.pattern.permute.xlu0 %v1463_v15  ;;  %1330 = vset.pattern.permute.xlu1 %v1465_v19 }
  0x5f   :  { %173 = vperm.xlu0 %1348, %v1525_v5   ;;  %257 = vperm.xlu1 %1330, %v1525_v5  }
  0x63   :  { %185 = vperm.xlu0 %1348, %v1529_v7   ;;  %265 = vperm.xlu1 %1330, %v1545_v12  }
  0x67   :  { %616 = vperm.xlu0 %1348, %v1566_v16   ;;  %269 = vperm.xlu1 %1330, %v1529_v7  }
  0x6b   :  { %1350 = vset.pattern.permute.xlu0 %v1464_v17  ;;  %1331 = vset.pattern.permute.xlu1 %v1466_v20 }
  0x6c   :  { %205 = vperm.xlu0 %1350, %v1522_v2   ;;  %289 = vperm.xlu1 %1331, %v1522_v2  }
  0x70   :  { %636 = vperm.xlu0 %1350, %v1578_v18   ;;  %293 = vperm.xlu1 %1331, %v1545_v12  }
  0x74   :  { %1353 = vset.pattern.permute.xlu0 %v1465_v19  ;;  %1332 = vset.pattern.permute.xlu1 %v1460_v10 }
  0x75   :  { %261 = vperm.xlu0 %1353, %v1522_v2   ;;  %313 = vperm.xlu1 %1332, %v1525_v5  }
  0x79   :  { %664 = vperm.xlu0 %1353, %v1566_v16   ;;  %321 = vperm.xlu1 %1332, %v1545_v12  }
  0x7d   :  { %1355 = vset.pattern.permute.xlu0 %v1466_v20  ;;  %325 = vperm.xlu1 %1332, %v1529_v7  }
  0x7e   :  { %285 = vperm.xlu0 %1355, %v1525_v5  }
  0x81   :  { %1334 = vset.pattern.permute.xlu1 %v1467_v21 }
  0x82   :  { %297 = vperm.xlu0 %1355, %v1529_v7   ;;  %345 = vperm.xlu1 %1334, %v1522_v2  }
  0x86   :  { %684 = vperm.xlu0 %1355, %v1578_v18   ;;  %349 = vperm.xlu1 %1334, %v1545_v12  }
  0x8a   :  { %1358 = vset.pattern.permute.xlu0 %v1467_v21  ;;  %1335 = vset.pattern.permute.xlu1 %v1468_v22 }
  0x8b   :  { %341 = vperm.xlu0 %1358, %v1525_v5   ;;  %369 = vperm.xlu1 %1335, %v1525_v5  }
  0x8f   :  { %353 = vperm.xlu0 %1358, %v1529_v7   ;;  %377 = vperm.xlu1 %1335, %v1545_v12  }
  0x93   :  { %712 = vperm.xlu0 %1358, %v1566_v16   ;;  %381 = vperm.xlu1 %1335, %v1529_v7   ;;  %v51_v23 = vpop.permute.xlu1 %50  ;;  %v1618_v24 = vpop.permute.xlu0 %149 }
  0x94   :  { %v61_v52 = vmul.f32 %v1679_v47, %v51_v23 }
  0x97   :  { %1360 = vset.pattern.permute.xlu0 %v1468_v22  ;;  %1337 = vset.pattern.permute.xlu1 %v1461_v11  ;;  %v1622_v25 = vpop.permute.xlu1 %54 }
  0x98   :  { %373 = vperm.xlu0 %1360, %v1522_v2   ;;  %401 = vperm.xlu1 %1337, %v1522_v2   ;;  %v1626_v26 = vpop.permute.xlu0 %229 }
  0x9c   :  { %732 = vperm.xlu0 %1360, %v1578_v18   ;;  %405 = vperm.xlu1 %1337, %v1545_v12   ;;  %v1630_v27 = vpop.permute.xlu1 %72  ;;  %v1632_v28 = vpop.permute.xlu0 %241 }
  0xa0   :  { %1363 = vset.pattern.permute.xlu0 %v2106_v29  ;;  %1338 = vset.pattern.permute.xlu1 %v2106_v29  ;;  %v1636_v30 = vpop.permute.xlu1 %95 }
  0xa1   :  { %429 = vperm.xlu0 %1363, %v1522_v2   ;;  %425 = vperm.xlu1 %1338, %v1525_v5   ;;  %v1640_v31 = vpop.permute.xlu0 %317 }
  0xa4   :  { %v1642_v32 = vpop.permute.xlu1 %105 }
  0xa5   :  { %760 = vperm.xlu0 %1363, %v1566_v16   ;;  %433 = vperm.xlu1 %1338, %v1545_v12  }
  0xa6   :  { %v1646_v33 = vpop.permute.xlu0 %397 }
  0xa9   :  { %1365 = vset.pattern.permute.xlu0 %v2103_v35  ;;  %437 = vperm.xlu1 %1338, %v1529_v7   ;;  %v1650_v36 = vpop.permute.xlu1 %121 }
  0xaa   :  { %453 = vperm.xlu0 %1365, %v1525_v5   ;;  %v1653_v37 = vpop.permute.xlu0 %409 }
  0xad   :  { %1339 = vset.pattern.permute.xlu1 %v2103_v35  ;;  %v126_v39 = vpop.permute.xlu1 %125 }
  0xae   :  { %465 = vperm.xlu0 %1365, %v1529_v7   ;;  %457 = vperm.xlu1 %1339, %v1522_v2  }
  0xaf   :  { %v1660_v40 = vpop.permute.xlu0 %485 }
  0xb2   :  { %780 = vperm.xlu0 %1365, %v1578_v18   ;;  %461 = vperm.xlu1 %1339, %v1545_v12   ;;  %v1673_v44 = vpop.permute.xlu1 %145 }
  0xb4   :  { %v36_v46 = vpop.permute.xlu0 %35 }
  0xb5   :  { %v47_v50 = vmul.f32 %v1676_v45, %v36_v46 }
  0xb6   :  { %1368 = vset.pattern.permute.xlu0 %v2101_v48  ;;  %1340 = vset.pattern.permute.xlu1 %v2097_v13  ;;  %v154_v49 = vpop.permute.xlu1 %153 }
  0xb7   :  { %509 = vperm.xlu0 %1368, %v1525_v5   ;;  %481 = vperm.xlu1 %1340, %v1525_v5   ;;  %v63_v54 = vadd.f32 %v61_v52, %v47_v50  ;;  %v1730_v52 = vsub.s32 4, %v1655_v38 }
  0xb8   :  { %v1686_v51 = vpop.permute.xlu0 %40 }
  0xba   :  { %v1689_v53 = vpop.permute.xlu1 %157 }
  0xbb   :  { %521 = vperm.xlu0 %1368, %v1529_v7   ;;  %489 = vperm.xlu1 %1340, %v1545_v12  }
  0xbc   :  { %v68_v55 = vpop.permute.xlu0 %67 }
  0xbd   :  { %v75_v56 = vadd.f32 %v68_v55, %v63_v54  ;;  %v2095_v54 = vmov 18  }
  0xbf   :  { %v1693_v57 = vmax.f32 %v75_v56, 0.0  ;;  %808 = vperm.xlu0 %1368, %v1566_v16   ;;  %493 = vperm.xlu1 %1340, %v1529_v7   ;;  %v1700_v59 = vpop.permute.xlu1 %177 }
  0xc0   :  { %v91_v60 = vpop.permute.xlu0 %90 }
  0xc1   :  { %v1707_v62 = vrot.slane %v1693_v57, %v1663_v41  ;;  %v1711_v63 = vrot.slane %v1693_v57, %v1666_v42  ;;  %v1715_v3 = vrot.slane %v1693_v57, %v1698_v58  ;;  %v1723_v23 = vrot.slane %v1693_v57, %v1703_v61 }
  0xc3   :  { %1372 = vset.pattern.permute.xlu0 %v2092_v4  ;;  %v182_v5 = vpop.permute.xlu1 %181  ;;  %v112_v7 = vmul.f32 %v1707_v62, %v91_v60  ;;  %1343 = vset.pattern.permute.xlu1 %v2101_v48  ;;  %v138_v43 = vmul.f32 %v1711_v63, %v126_v39  ;;  %v166_v50 = vmul.f32 %v1715_v3, %v154_v49 }
  0xc4   :  { %828 = vperm.xlu0 %1372, %v1578_v18   ;;  %v101_v8 = vpop.permute.xlu0 %100  ;;  %513 = vperm.xlu1 %1343, %v1522_v2   ;;  %v194_v60 = vmul.f32 %v1723_v23, %v182_v5  ;;  %v1740_v2 = vrot.slane %v1693_v57, %v1730_v52 }
  0xc5   :  { %v114_v34 = vmul.f32 %v1707_v62, %v101_v8 }
  0xc7   :  { %v142_v46 = vadd.f32 %v138_v43, %v114_v34  ;;  %v2093_v34 = vmov 21  }
  0xc8   :  { %1374 = vset.pattern.permute.xlu0 %v2095_v54  ;;  %v202_v55 = vpop.permute.xlu1 %201  ;;  %v1733_v56 = vpop.permute.xlu0 %569  ;;  %517 = vperm.xlu1 %1343, %v1545_v12  }
  0xc9   :  { %v170_v4 = vadd.f32 %v166_v50, %v142_v46  ;;  %856 = vperm.xlu0 %1374, %v1566_v16  }
  0xcb   :  { %v198_v39 = vadd.f32 %v194_v60, %v170_v4  ;;  %v86_v4 = vld [vmem:[%s2090_s2 + $0x10] sm:$0xff]  ;;  %v164_v60 = vmul.f32 %v1715_v3, %v1673_v44  ;;  %v1762_v44 = vsub.s32 5, %v1655_v38 }
  0xcc   :  { %v210_v49 = vpop.permute.xlu1 %209  ;;  %1344 = vset.pattern.permute.xlu1 %v2100_v1 }
  0xcd   :  { %v222_v8 = vmul.f32 %v1740_v2, %v210_v49  ;;  %1377 = vset.pattern.permute.xlu0 %v2093_v34  ;;  %v118_v43 = vpop.permute.xlu0 %117  ;;  %538 = vperm.xlu1 %1344, %v1557_v14   ;;  %v115_v34 = vmul.f32 %v1707_v62, %v1642_v32  ;;  %v2094_v14 = vmov 24   ;;  %v167_v32 = vmul.f32 %v1715_v3, %v1689_v53 }
  0xce   :  { %v136_v5 = vmul.f32 %v1711_v63, %v118_v43  ;;  %904 = vperm.xlu0 %1377, %v1566_v16  }
  0xcf   :  { %v226_v12 = vadd.f32 %v222_v8, %v198_v39 }
  0xd0   :  { %v140_v46 = vadd.f32 %v136_v5, %v112_v7  ;;  %v214_v50 = vpop.permute.xlu1 %213  ;;  %v87_v7 = vld [vmem:[%s2090_s2 + $0x18] sm:$0xff] }
  0xd1   :  { %v130_v49 = vpop.permute.xlu0 %129  ;;  %548 = vperm.xlu1 %1344, %v86_v4  }
  0xd2   :  { %v139_v43 = vmul.f32 %v1711_v63, %v130_v49  ;;  %1380 = vset.pattern.permute.xlu0 %v2094_v14  ;;  %v168_v39 = vadd.f32 %v164_v60, %v140_v46  ;;  %v2096_v46 = vmov 19   ;;  %v1773_v60 = vrot.slane %v1693_v57, %v1762_v44 }
  0xd3   :  { %952 = vperm.xlu0 %1380, %v1566_v16  }
  0xd4   :  { %v143_v8 = vadd.f32 %v139_v43, %v115_v34 }
  0xd5   :  { %v1766_v5 = vpop.permute.xlu1 %233  ;;  %v1768_v4 = vpop.permute.xlu0 %543  ;;  %553 = vperm.xlu1 %1344, %v87_v7  }
  0xd6   :  { %v171_v49 = vadd.f32 %v167_v32, %v143_v8  ;;  %v2099_v8 = vmov 22   ;;  %v1784_v32 = vsub.s32 6, %v1655_v38 }
  0xd7   :  { %1383 = vset.pattern.permute.xlu0 %v2096_v46 }
  0xd8   :  { %876 = vperm.xlu0 %1383, %v1578_v18  }
  0xd9   :  { %v238_v34 = vpop.permute.xlu1 %237  ;;  %v1776_v43 = vpop.permute.xlu0 %588  ;;  %1346 = vset.pattern.permute.xlu1 %v1459_v9 }
  0xda   :  { %v250_v53 = vmul.f32 %v1773_v60, %v238_v34  ;;  %574 = vperm.xlu1 %1346, %v1578_v18   ;;  %v220_v34 = vmul.f32 %v1740_v2, %v202_v55  ;;  %v248_v55 = vmul.f32 %v1773_v60, %v1626_v26 }
  0xdc   :  { %v254_v7 = vadd.f32 %v250_v53, %v226_v12  ;;  %1388 = vset.pattern.permute.xlu0 %v2099_v8  ;;  %v1792_v12 = vrot.slane %v1693_v57, %v1784_v32  ;;  %v2105_v53 = vmov 30   ;;  %v113_v8 = vmul.f32 %v1707_v62, %v1636_v30 }
  0xdd   :  { %924 = vperm.xlu0 %1388, %v1578_v18   ;;  %v223_v30 = vmul.f32 %v1740_v2, %v214_v50 }
  0xde   :  { %v174_v14 = vpop.permute.xlu0 %173  ;;  %v258_v54 = vpop.permute.xlu1 %257  ;;  %1347 = vset.pattern.permute.xlu1 %v2100_v1 }
  0xdf   :  { %v192_v46 = vmul.f32 %v1723_v23, %v174_v14  ;;  %584 = vperm.xlu1 %1347, %v1566_v16   ;;  %v137_v14 = vmul.f32 %v1711_v63, %v1650_v36  ;;  %v276_v62 = vmul.f32 %v1792_v12, %v258_v54 }
  0xe1   :  { %v196_v13 = vadd.f32 %v192_v46, %v168_v39  ;;  %1391 = vset.pattern.permute.xlu0 %v2105_v53  ;;  %v48_v53 = vmul.f32 %v1676_v45, %v1686_v51  ;;  %v141_v45 = vadd.f32 %v137_v14, %v113_v8  ;;  %v1480_v14 = vmov 27  }
  0xe2   :  { %1048 = vperm.xlu0 %1391, %v1566_v16   ;;  %v186_v1 = vpop.permute.xlu0 %185  ;;  %v266_v48 = vpop.permute.xlu1 %265 }
  0xe3   :  { %v224_v35 = vadd.f32 %v220_v34, %v196_v13  ;;  %v195_v39 = vmul.f32 %v1723_v23, %v186_v1  ;;  %v278_v46 = vmul.f32 %v1792_v12, %v266_v48  ;;  %1349 = vset.pattern.permute.xlu1 %v1456_v0  ;;  %v62_v13 = vmul.f32 %v1679_v47, %v1622_v25 }
  0xe4   :  { %600 = vperm.xlu1 %1349, %v1566_v16   ;;  %v1479_v1 = vmov 25   ;;  %v1823_v47 = vsub.s32 7, %v1655_v38 }
  0xe5   :  { %v252_v36 = vadd.f32 %v248_v55, %v224_v35  ;;  %v199_v63 = vadd.f32 %v195_v39, %v171_v49  ;;  %v282_v29 = vadd.f32 %v278_v46, %v254_v7  ;;  %v251_v35 = vmul.f32 %v1773_v60, %v1632_v28 }
  0xe6   :  { %1394 = vset.pattern.permute.xlu0 %v1479_v1  ;;  %v270_v26 = vpop.permute.xlu1 %269  ;;  %v1813_v48 = vpop.permute.xlu0 %616  ;;  %v64_v54 = vadd.f32 %v62_v13, %v48_v53  ;;  %v165_v49 = vmul.f32 %v1715_v3, %v1618_v24  ;;  %v193_v24 = vmul.f32 %v1723_v23, %v1700_v59  ;;  %v303_v38 = vrot.slane %v1693_v57, %v1823_v47 }
  0xe7   :  { %v280_v51 = vadd.f32 %v276_v62, %v252_v36  ;;  %v227_v50 = vadd.f32 %v223_v30, %v199_v63  ;;  %972 = vperm.xlu0 %1394, %v1578_v18   ;;  %v279_v25 = vmul.f32 %v1792_v12, %v270_v26  ;;  %v249_v23 = vmul.f32 %v1773_v60, %v1766_v5 }
  0xe8   :  { %604 = vperm.xlu1 %1349, %v1578_v18   ;;  %v169_v8 = vadd.f32 %v165_v49, %v141_v45  ;;  %v76_v53 = vadd.f32 %v1630_v27, %v64_v54 }
  0xe9   :  { %v255_v7 = vadd.f32 %v251_v35, %v227_v50 }
  0xea   :  { %v197_v39 = vadd.f32 %v193_v24, %v169_v8  ;;  %v1837_v27 = vmax.f32 %v76_v53, 0.0 }
  0xeb   :  { %v283_v34 = vadd.f32 %v279_v25, %v255_v7  ;;  %1395 = vset.pattern.permute.xlu0 %v1480_v14  ;;  %v206_v55 = vpop.permute.xlu0 %205  ;;  %v290_v28 = vpop.permute.xlu1 %289 }
  0xec   :  { %1000 = vperm.xlu0 %1395, %v1566_v16   ;;  %v221_v3 = vmul.f32 %v1740_v2, %v206_v55  ;;  %1351 = vset.pattern.permute.xlu1 %v1463_v15  ;;  %v331_v26 = vrot.slane %v1837_v27, %v1663_v41  ;;  %v305_v45 = vmul.f32 %v303_v38, %v290_v28 }
  0xed   :  { %620 = vperm.xlu1 %1351, %v1578_v18   ;;  %v359_v55 = vrot.slane %v1837_v27, %v1666_v42 }
  0xee   :  { %v225_v62 = vadd.f32 %v221_v3, %v197_v39  ;;  %v333_v54 = vmul.f32 %v331_v26, %v1640_v31 }
  0xef   :  { %v294_v46 = vpop.permute.xlu1 %293  ;;  %v1834_v30 = vpop.permute.xlu0 %636 }
  0xf0   :  { %v306_v36 = vmul.f32 %v303_v38, %v294_v46  ;;  %1004 = vperm.xlu0 %1395, %v1578_v18   ;;  %v253_v63 = vadd.f32 %v249_v23, %v225_v62 }
  0xf1   :  { %1352 = vset.pattern.permute.xlu1 %v1464_v17 }
  0xf2   :  { %v310_v59 = vadd.f32 %v306_v36, %v282_v29  ;;  %632 = vperm.xlu1 %1352, %v1566_v16  }
  0xf4   :  { %v262_v57 = vpop.permute.xlu0 %261  ;;  %v314_v2 = vpop.permute.xlu1 %313  ;;  %1400 = vset.pattern.permute.xlu0 %v1459_v9 }
  0xf5   :  { %v277_v13 = vmul.f32 %v1792_v12, %v262_v57  ;;  %v332_v8 = vmul.f32 %v331_v26, %v314_v2 }
  0xf6   :  { %1354 = vset.pattern.permute.xlu1 %v1458_v6 }
  0xf7   :  { %v281_v50 = vadd.f32 %v277_v13, %v253_v63  ;;  %648 = vperm.xlu1 %1354, %v1566_v16   ;;  %v415_v13 = vrot.slane %v1837_v27, %v1703_v61 }
  0xf8   :  { %v322_v29 = vpop.permute.xlu1 %321  ;;  %v1849_v5 = vpop.permute.xlu0 %664 }
  0xf9   :  { %v309_v60 = vadd.f32 %v305_v45, %v281_v50  ;;  %v334_v35 = vmul.f32 %v331_v26, %v322_v29 }
  0xfb   :  { %v338_v9 = vadd.f32 %v334_v35, %v310_v59  ;;  %v337_v49 = vadd.f32 %v333_v54, %v309_v60  ;;  %652 = vperm.xlu1 %1354, %v1578_v18  }
  0xfc   :  { %v326_v12 = vpop.permute.xlu1 %325 }
  0xfd   :  { %v286_v7 = vpop.permute.xlu0 %285  ;;  %v335_v39 = vmul.f32 %v331_v26, %v326_v12 }
  0xfe   :  { %v304_v25 = vmul.f32 %v303_v38, %v286_v7 }
  0xff   :  { %1356 = vset.pattern.permute.xlu1 %v1465_v19 }
 0x100   :  { %v308_v14 = vadd.f32 %v304_v25, %v280_v51  ;;  %668 = vperm.xlu1 %1356, %v1578_v18   ;;  %v1869_v25 = vld [vmem:[#allocation2 + $0x60] sm:$0xf] }
 0x101   :  { %v298_v28 = vpop.permute.xlu0 %297  ;;  %v346_v53 = vpop.permute.xlu1 %345  ;;  %1096 = vperm.xlu0 %1400, %v1869_v25  }
 0x102   :  { %v307_v24 = vmul.f32 %v303_v38, %v298_v28  ;;  %v361_v31 = vmul.f32 %v359_v55, %v346_v53  ;;  %v336_v3 = vadd.f32 %v332_v8, %v308_v14  ;;  %v419_v53 = vmul.f32 %v415_v13, %v1653_v37 }
 0x104   :  { %v311_v46 = vadd.f32 %v307_v24, %v283_v34  ;;  %v365_v36 = vadd.f32 %v361_v31, %v337_v49  ;;  %1357 = vset.pattern.permute.xlu1 %v1466_v20  ;;  %v387_v34 = vrot.slane %v1837_v27, %v1698_v58 }
 0x105   :  { %v350_v62 = vpop.permute.xlu1 %349  ;;  %v1858_v59 = vpop.permute.xlu0 %684  ;;  %680 = vperm.xlu1 %1357, %v1566_v16   ;;  %1403 = vset.pattern.permute.xlu0 %v1456_v0 }
 0x106   :  { %v362_v51 = vmul.f32 %v359_v55, %v350_v62  ;;  %v339_v23 = vadd.f32 %v335_v39, %v311_v46  ;;  %1115 = vperm.xlu0 %1403, %v1869_v25  }
 0x108   :  { %v366_v57 = vadd.f32 %v362_v51, %v338_v9  ;;  %v416_v9 = vmul.f32 %v415_v13, %v1646_v33 }
 0x109   :  { %1359 = vset.pattern.permute.xlu1 %v1460_v10 }
 0x10a   :  { %v342_v2 = vpop.permute.xlu0 %341  ;;  %v370_v63 = vpop.permute.xlu1 %369  ;;  %696 = vperm.xlu1 %1359, %v1566_v16   ;;  %1406 = vset.pattern.permute.xlu0 %v1464_v17 }
 0x10b   :  { %v360_v38 = vmul.f32 %v359_v55, %v342_v2  ;;  %v388_v45 = vmul.f32 %v387_v34, %v370_v63  ;;  %1135 = vperm.xlu0 %1406, %v1869_v25   ;;  %v443_v2 = vrot.slane %v1837_v27, %v1730_v52 }
 0x10d   :  { %v364_v26 = vadd.f32 %v360_v38, %v336_v3 }
 0x10e   :  { %v354_v50 = vpop.permute.xlu0 %353  ;;  %v378_v29 = vpop.permute.xlu1 %377  ;;  %700 = vperm.xlu1 %1359, %v1578_v18  }
 0x10f   :  { %v392_v60 = vadd.f32 %v388_v45, %v364_v26  ;;  %v363_v35 = vmul.f32 %v359_v55, %v354_v50  ;;  %v390_v54 = vmul.f32 %v387_v34, %v378_v29  ;;  %1409 = vset.pattern.permute.xlu0 %v1465_v19  ;;  %v2108_v29 = vmov 12  }
 0x110   :  { %1155 = vperm.xlu0 %1409, %v1869_v25  }
 0x111   :  { %v367_v49 = vadd.f32 %v363_v35, %v339_v23  ;;  %v394_v12 = vadd.f32 %v390_v54, %v366_v57  ;;  %v420_v7 = vadd.f32 %v416_v9, %v392_v60  ;;  %v471_v35 = vrot.slane %v1837_v27, %v1762_v44 }
 0x112   :  { %v382_v8 = vpop.permute.xlu1 %381  ;;  %v1871_v14 = vpop.permute.xlu0 %712  ;;  %1361 = vset.pattern.permute.xlu1 %v1467_v21 }
 0x113   :  { %v391_v28 = vmul.f32 %v387_v34, %v382_v8  ;;  %716 = vperm.xlu1 %1361, %v1578_v18   ;;  %v499_v8 = vrot.slane %v1837_v27, %v1784_v32 }
 0x114   :  { %1412 = vset.pattern.permute.xlu0 %v1467_v21 }
 0x115   :  { %v395_v55 = vadd.f32 %v391_v28, %v367_v49  ;;  %1185 = vperm.xlu0 %1412, %v1869_v25  }
 0x117   :  { %v374_v33 = vpop.permute.xlu0 %373  ;;  %v402_v24 = vpop.permute.xlu1 %401  ;;  %v423_v31 = vadd.f32 %v419_v53, %v395_v55  ;;  %1362 = vset.pattern.permute.xlu1 %v1468_v22 }
 0x118   :  { %v389_v3 = vmul.f32 %v387_v34, %v374_v33  ;;  %728 = vperm.xlu1 %1362, %v1566_v16   ;;  %v417_v46 = vmul.f32 %v415_v13, %v402_v24  ;;  %v2110_v24 = vmov 15  }
 0x119   :  { %1415 = vset.pattern.permute.xlu0 %v2108_v29 }
 0x11a   :  { %v393_v39 = vadd.f32 %v389_v3, %v365_v36  ;;  %1215 = vperm.xlu0 %1415, %v1869_v25  }
 0x11b   :  { %v406_v62 = vpop.permute.xlu1 %405  ;;  %v1881_v51 = vpop.permute.xlu0 %732 }
 0x11c   :  { %v421_v37 = vadd.f32 %v417_v46, %v393_v39  ;;  %v418_v23 = vmul.f32 %v415_v13, %v406_v62  ;;  %1364 = vset.pattern.permute.xlu1 %v1461_v11  ;;  %v2111_v46 = vmov 14  }
 0x11d   :  { %744 = vperm.xlu1 %1364, %v1566_v16  }
 0x11e   :  { %v422_v57 = vadd.f32 %v418_v23, %v394_v12  ;;  %1418 = vset.pattern.permute.xlu0 %v2110_v24 }
 0x11f   :  { %1245 = vperm.xlu0 %1418, %v1869_v25  }
 0x120   :  { %v430_v63 = vpop.permute.xlu0 %429  ;;  %v426_v36 = vpop.permute.xlu1 %425 }
 0x121   :  { %v445_v38 = vmul.f32 %v443_v2, %v430_v63  ;;  %v444_v34 = vmul.f32 %v443_v2, %v426_v36  ;;  %748 = vperm.xlu1 %1364, %v1578_v18  }
 0x123   :  { %v449_v17 = vadd.f32 %v445_v38, %v421_v37  ;;  %v448_v13 = vadd.f32 %v444_v34, %v420_v7  ;;  %v2109_v7 = vmov 13   ;;  %1420 = vset.pattern.permute.xlu0 %v1463_v15  ;;  %v527_v38 = vrot.slane %v1837_v27, %v1823_v47 }
 0x124   :  { %v434_v26 = vpop.permute.xlu1 %433  ;;  %v1892_v45 = vpop.permute.xlu0 %760 }
 0x125   :  { %v446_v50 = vmul.f32 %v443_v2, %v434_v26  ;;  %1366 = vset.pattern.permute.xlu1 %v2108_v29 }
 0x126   :  { %764 = vperm.xlu1 %1366, %v1578_v18  }
 0x127   :  { %v450_v60 = vadd.f32 %v446_v50, %v422_v57 }
 0x128   :  { %v438_v19 = vpop.permute.xlu1 %437 }
 0x129   :  { %v447_v54 = vmul.f32 %v443_v2, %v438_v19  ;;  %v454_v9 = vpop.permute.xlu0 %453  ;;  %v2112_v19 = vmov 16  }
 0x12a   :  { %v472_v49 = vmul.f32 %v471_v35, %v454_v9  ;;  %1367 = vset.pattern.permute.xlu1 %v2109_v7 }
 0x12b   :  { %v451_v12 = vadd.f32 %v447_v54, %v423_v31  ;;  %776 = vperm.xlu1 %1367, %v1566_v16   ;;  %v501_v31 = vmul.f32 %v499_v8, %v1660_v40 }
 0x12c   :  { %v476_v21 = vadd.f32 %v472_v49, %v448_v13  ;;  %v1481_v49 = vmov 17  }
 0x12d   :  { %v466_v28 = vpop.permute.xlu0 %465  ;;  %v458_v55 = vpop.permute.xlu1 %457 }
 0x12e   :  { %v475_v53 = vmul.f32 %v471_v35, %v466_v28  ;;  %v473_v33 = vmul.f32 %v471_v35, %v458_v55 }
 0x12f   :  { %1369 = vset.pattern.permute.xlu1 %v2111_v46 }
 0x130   :  { %v479_v3 = vadd.f32 %v475_v53, %v451_v12  ;;  %v477_v39 = vadd.f32 %v473_v33, %v449_v17  ;;  %792 = vperm.xlu1 %1369, %v1566_v16  }
 0x131   :  { %v462_v62 = vpop.permute.xlu1 %461  ;;  %v1911_v37 = vpop.permute.xlu0 %780 }
 0x132   :  { %v474_v23 = vmul.f32 %v471_v35, %v462_v62  ;;  %v505_v57 = vadd.f32 %v501_v31, %v477_v39 }
 0x134   :  { %v478_v2 = vadd.f32 %v474_v23, %v450_v60  ;;  %796 = vperm.xlu1 %1369, %v1578_v18  }
 0x136   :  { %v510_v63 = vpop.permute.xlu0 %509  ;;  %v482_v36 = vpop.permute.xlu1 %481 }
 0x137   :  { %v500_v40 = vmul.f32 %v499_v8, %v482_v36  ;;  %v528_v34 = vmul.f32 %v527_v38, %v510_v63  ;;  %v2114_v63 = vmov 22  }
 0x138   :  { %1370 = vset.pattern.permute.xlu1 %v2110_v24 }
 0x139   :  { %v504_v17 = vadd.f32 %v500_v40, %v476_v21  ;;  %812 = vperm.xlu1 %1370, %v1578_v18   ;;  %v2115_v40 = vmov 18  }
 0x13a   :  { %v490_v13 = vpop.permute.xlu1 %489  ;;  %v522_v60 = vpop.permute.xlu0 %521 }
 0x13b   :  { %v502_v26 = vmul.f32 %v499_v8, %v490_v13  ;;  %v532_v50 = vadd.f32 %v528_v34, %v504_v17  ;;  %v531_v9 = vmul.f32 %v527_v38, %v522_v60 }
 0x13d   :  { %v506_v29 = vadd.f32 %v502_v26, %v478_v2  ;;  %1371 = vset.pattern.permute.xlu1 %v2112_v19  ;;  %v1484_v19 = vmov 26  }
 0x13e   :  { %v494_v35 = vpop.permute.xlu1 %493  ;;  %824 = vperm.xlu1 %1371, %v1566_v16  }
 0x13f   :  { %v503_v54 = vmul.f32 %v499_v8, %v494_v35 }
 0x141   :  { %v507_v27 = vadd.f32 %v503_v54, %v479_v3  ;;  %v2113_v3 = vmov 19  }
 0x142   :  { %1373 = vset.pattern.permute.xlu1 %v1481_v49 }
 0x143   :  { %v1921_v12 = vadd.f32 %v531_v9, %v507_v27  ;;  %840 = vperm.xlu1 %1373, %v1566_v16   ;;  %v514_v21 = vpop.permute.xlu1 %513 }
 0x144   :  { %v529_v28 = vmul.f32 %v527_v38, %v514_v21 }
 0x146   :  { %v533_v55 = vadd.f32 %v529_v28, %v505_v57  ;;  %v1482_v57 = vmov 20  }
 0x147   :  { %844 = vperm.xlu1 %1373, %v1578_v18   ;;  %v518_v53 = vpop.permute.xlu1 %517 }
 0x148   :  { %v557_v33 = vadd.f32 %v1768_v4, %v533_v55  ;;  %v530_v24 = vmul.f32 %v527_v38, %v518_v53  ;;  %v1483_v38 = vmov 23  }
 0x14a   :  { %v1926_v39 = vmax.f32 %v557_v33, 0.0  ;;  %v1928_v8 = vadd.f32 %v530_v24, %v506_v29 }
 0x14b   :  { %1375 = vset.pattern.permute.xlu1 %v2113_v3 }
 0x14c   :  { %872 = vperm.xlu1 %1375, %v1566_v16   ;;  %v539_v31 = vpop.permute.xlu1 %538  ;;  %v1934_v62 = vrot.slane %v1926_v39, %v1698_v58 }
 0x14d   :  { %v556_v34 = vadd.f32 %v539_v31, %v532_v50 }
 0x14e   :  { %v1938_v23 = vmul.f32 %v1934_v62, %v1881_v51 }
 0x14f   :  { %v560_v13 = vmax.f32 %v556_v34, 0.0 }
 0x150   :  { %1376 = vset.pattern.permute.xlu1 %v1482_v57  ;;  %v1940_v4 = vpop.permute.xlu1 %548 }
 0x151   :  { %888 = vperm.xlu1 %1376, %v1566_v16   ;;  %v580_v29 = vrot.slane %v560_v13, %v1663_v41  ;;  %v594_v60 = vrot.slane %v560_v13, %v1666_v42  ;;  %v610_v54 = vrot.slane %v560_v13, %v1698_v58  ;;  %v626_v21 = vrot.slane %v560_v13, %v1703_v61 }
 0x152   :  { %v642_v24 = vrot.slane %v560_v13, %v1730_v52 }
 0x153   :  { %v581_v9 = vmul.f32 %v580_v29, %v1733_v56  ;;  %v596_v28 = vmul.f32 %v594_v60, %v1776_v43  ;;  %v627_v31 = vmul.f32 %v626_v21, %v1813_v48  ;;  %v674_v43 = vrot.slane %v560_v13, %v1784_v32 }
 0x154   :  { %v1943_v2 = vpop.permute.xlu1 %553  ;;  %v644_v48 = vmul.f32 %v642_v24, %v1834_v30 }
 0x155   :  { %1378 = vset.pattern.permute.xlu1 %v2114_v63 }
 0x156   :  { %920 = vperm.xlu1 %1378, %v1566_v16  }
 0x159   :  { %v575_v36 = vpop.permute.xlu1 %574 }
 0x15a   :  { %1379 = vset.pattern.permute.xlu1 %v1483_v38  ;;  %v582_v27 = vmul.f32 %v580_v29, %v575_v36 }
 0x15b   :  { %936 = vperm.xlu1 %1379, %v1566_v16  }
 0x15c   :  { %v598_v3 = vadd.f32 %v596_v28, %v582_v27  ;;  %v690_v28 = vrot.slane %v560_v13, %v1823_v47 }
 0x15e   :  { %v585_v51 = vpop.permute.xlu1 %584  ;;  %v692_v30 = vmul.f32 %v690_v28, %v1858_v59  ;;  %v1487_v59 = vmov 31  }
 0x15f   :  { %1381 = vset.pattern.permute.xlu1 %v2115_v40  ;;  %v595_v35 = vmul.f32 %v594_v60, %v585_v51  ;;  %v2116_v51 = vmov 21   ;;  %v658_v40 = vrot.slane %v560_v13, %v1762_v44  ;;  %v1485_v60 = vmov 28  }
 0x160   :  { %860 = vperm.xlu1 %1381, %v1578_v18   ;;  %v722_v13 = vrot.slane %v1926_v39, %v1666_v42 }
 0x161   :  { %v597_v49 = vadd.f32 %v595_v35, %v581_v9 }
 0x163   :  { %v601_v17 = vpop.permute.xlu1 %600 }
 0x164   :  { %1382 = vset.pattern.permute.xlu1 %v1479_v1  ;;  %v611_v1 = vmul.f32 %v610_v54, %v601_v17 }
 0x165   :  { %968 = vperm.xlu1 %1382, %v1566_v16  }
 0x166   :  { %v613_v55 = vadd.f32 %v611_v1, %v597_v49 }
 0x167   :  { %v605_v26 = vpop.permute.xlu1 %604 }
 0x168   :  { %v612_v53 = vmul.f32 %v610_v54, %v605_v26  ;;  %v629_v36 = vadd.f32 %v627_v31, %v613_v55  ;;  %v675_v54 = vmul.f32 %v674_v43, %v1849_v5 }
 0x169   :  { %1384 = vset.pattern.permute.xlu1 %v1484_v19 }
 0x16a   :  { %984 = vperm.xlu1 %1384, %v1566_v16  }
 0x16c   :  { %v621_v50 = vpop.permute.xlu1 %620 }
 0x16d   :  { %v628_v63 = vmul.f32 %v626_v21, %v621_v50  ;;  %v1486_v21 = vmov 29  }
 0x16e   :  { %1385 = vset.pattern.permute.xlu1 %v1482_v57  ;;  %v614_v57 = vadd.f32 %v612_v53, %v598_v3 }
 0x16f   :  { %892 = vperm.xlu1 %1385, %v1578_v18  }
 0x170   :  { %v630_v17 = vadd.f32 %v628_v63, %v614_v57  ;;  %v2117_v63 = vmov 24   ;;  %v723_v57 = vmul.f32 %v722_v13, %v1871_v14 }
 0x171   :  { %v633_v33 = vpop.permute.xlu1 %632 }
 0x172   :  { %v643_v56 = vmul.f32 %v642_v24, %v633_v33  ;;  %v646_v9 = vadd.f32 %v644_v48, %v630_v17 }
 0x173   :  { %1386 = vset.pattern.permute.xlu1 %v2116_v51 }
 0x174   :  { %908 = vperm.xlu1 %1386, %v1578_v18   ;;  %v645_v26 = vadd.f32 %v643_v56, %v629_v36  ;;  %v1425_v36 = vld [vmem:[#allocation2 + $0x40] sm:$0xff] }
 0x176   :  { %v649_v34 = vpop.permute.xlu1 %648 }
 0x177   :  { %v659_v29 = vmul.f32 %v658_v40, %v649_v34 }
 0x178   :  { %1387 = vset.pattern.permute.xlu1 %v1485_v60 }
 0x179   :  { %v661_v35 = vadd.f32 %v659_v29, %v645_v26  ;;  %1016 = vperm.xlu1 %1387, %v1566_v16  }
 0x17a   :  { %v653_v50 = vpop.permute.xlu1 %652 }
 0x17b   :  { %v660_v1 = vmul.f32 %v658_v40, %v653_v50  ;;  %v677_v27 = vadd.f32 %v675_v54, %v661_v35  ;;  %v1427_v35 = vld [vmem:[%s2090_s2] sm:$0xff] }
 0x17d   :  { %v662_v49 = vadd.f32 %v660_v1, %v646_v9  ;;  %1389 = vset.pattern.permute.xlu1 %v1486_v21  ;;  %v770_v1 = vrot.slane %v1926_v39, %v1730_v52 }
 0x17e   :  { %1032 = vperm.xlu1 %1389, %v1566_v16   ;;  %v706_v16 = vrot.slane %v1926_v39, %v1663_v41 }
 0x17f   :  { %v669_v55 = vpop.permute.xlu1 %668 }
 0x180   :  { %v676_v53 = vmul.f32 %v674_v43, %v669_v55  ;;  %v771_v55 = vmul.f32 %v770_v1, %v1892_v45 }
 0x182   :  { %v678_v33 = vadd.f32 %v676_v53, %v662_v49  ;;  %1390 = vset.pattern.permute.xlu1 %v1483_v38 }
 0x183   :  { %940 = vperm.xlu1 %1390, %v1578_v18  }
 0x184   :  { %v681_v5 = vpop.permute.xlu1 %680  ;;  %v694_v24 = vadd.f32 %v692_v30, %v678_v33  ;;  %v2118_v30 = vmov 1  }
 0x185   :  { %v691_v3 = vmul.f32 %v690_v28, %v681_v5 }
 0x187   :  { %v693_v31 = vadd.f32 %v691_v3, %v677_v27  ;;  %1392 = vset.pattern.permute.xlu1 %v2117_v63  ;;  %v2119_v63 = vmov 30  }
 0x188   :  { %956 = vperm.xlu1 %1392, %v1578_v18   ;;  %v1426_v18 = vld [vmem:[#allocation2 + $0x48] sm:$0xff] }
 0x189   :  { %v697_v56 = vpop.permute.xlu1 %696 }
 0x18a   :  { %v707_v38 = vmul.f32 %v706_v16, %v697_v56  ;;  %v802_v56 = vrot.slane %v1926_v39, %v1784_v32 }
 0x18c   :  { %v709_v51 = vadd.f32 %v707_v38, %v693_v31  ;;  %1393 = vset.pattern.permute.xlu1 %v1487_v59  ;;  %v818_v38 = vrot.slane %v1926_v39, %v1823_v47 }
 0x18d   :  { %1064 = vperm.xlu1 %1393, %v1425_v36   ;;  %v701_v40 = vpop.permute.xlu1 %700 }
 0x18e   :  { %v708_v43 = vmul.f32 %v706_v16, %v701_v40  ;;  %v725_v34 = vadd.f32 %v723_v57, %v709_v51  ;;  %v558_v51 = vadd.f32 %v1940_v4, %v1928_v8 }
 0x190   :  { %v710_v17 = vadd.f32 %v708_v43, %v694_v24 }
 0x191   :  { %1396 = vset.pattern.permute.xlu1 %v1484_v19  ;;  %v754_v19 = vrot.slane %v1926_v39, %v1703_v61 }
 0x192   :  { %988 = vperm.xlu1 %1396, %v1426_v18   ;;  %v717_v26 = vpop.permute.xlu1 %716 }
 0x193   :  { %v724_v29 = vmul.f32 %v722_v13, %v717_v26 }
 0x195   :  { %v726_v48 = vadd.f32 %v724_v29, %v710_v17 }
 0x196   :  { %1397 = vset.pattern.permute.xlu1 %v1456_v0 }
 0x197   :  { %1080 = vperm.xlu1 %1397, %v1427_v35   ;;  %v729_v14 = vpop.permute.xlu1 %728  ;;  %v742_v54 = vadd.f32 %v1938_v23, %v726_v48 }
 0x198   :  { %v739_v50 = vmul.f32 %v1934_v62, %v729_v14 }
 0x19a   :  { %v741_v9 = vadd.f32 %v739_v50, %v725_v34  ;;  %v2007_v34 = vmax.f32 %v558_v51, 0.0 }
 0x19b   :  { %1398 = vset.pattern.permute.xlu1 %v1485_v60  ;;  %v786_v60 = vrot.slane %v1926_v39, %v1762_v44 }
 0x19c   :  { %1020 = vperm.xlu1 %1398, %v1426_v18   ;;  %v745_v27 = vpop.permute.xlu1 %744  ;;  %v834_v8 = vrot.slane %v2007_v34, %v1663_v41 }
 0x19d   :  { %v755_v49 = vmul.f32 %v754_v19, %v745_v27  ;;  %v788_v31 = vmul.f32 %v786_v60, %v1911_v37  ;;  %v809_v37 = vpop.permute.xlu0 %808  ;;  %v850_v27 = vrot.slane %v2007_v34, %v1666_v42 }
 0x19e   :  { %v819_v43 = vmul.f32 %v818_v38, %v809_v37 }
 0x19f   :  { %v757_v28 = vadd.f32 %v755_v49, %v741_v9 }
 0x1a0   :  { %1399 = vset.pattern.permute.xlu1 %v1486_v21  ;;  %v749_v53 = vpop.permute.xlu1 %748 }
 0x1a1   :  { %v756_v33 = vmul.f32 %v754_v19, %v749_v53  ;;  %1036 = vperm.xlu1 %1399, %v1426_v18   ;;  %v773_v23 = vadd.f32 %v771_v55, %v757_v28 }
 0x1a3   :  { %v758_v62 = vadd.f32 %v756_v33, %v742_v54 }
 0x1a5   :  { %1401 = vset.pattern.permute.xlu1 %v2118_v30  ;;  %v765_v5 = vpop.permute.xlu1 %764  ;;  %v882_v30 = vrot.slane %v2007_v34, %v1703_v61 }
 0x1a6   :  { %v772_v24 = vmul.f32 %v770_v1, %v765_v5  ;;  %1105 = vperm.xlu1 %1401, %v1869_v25  }
 0x1a8   :  { %v774_v3 = vadd.f32 %v772_v24, %v758_v62 }
 0x1aa   :  { %1402 = vset.pattern.permute.xlu1 %v2119_v63  ;;  %v777_v45 = vpop.permute.xlu1 %776  ;;  %v790_v21 = vadd.f32 %v788_v31, %v774_v3  ;;  %v898_v31 = vrot.slane %v2007_v34, %v1730_v52 }
 0x1ab   :  { %v787_v16 = vmul.f32 %v786_v60, %v777_v45  ;;  %1052 = vperm.xlu1 %1402, %v1426_v18   ;;  %v559_v45 = vadd.f32 %v1943_v2, %v1921_v12 }
 0x1ad   :  { %v789_v13 = vadd.f32 %v787_v16, %v773_v23 }
 0x1af   :  { %1404 = vset.pattern.permute.xlu1 %v1487_v59  ;;  %v793_v57 = vpop.permute.xlu1 %792  ;;  %v829_v59 = vpop.permute.xlu0 %828 }
 0x1b0   :  { %v803_v36 = vmul.f32 %v802_v56, %v793_v57  ;;  %1068 = vperm.xlu1 %1404, %v1426_v18   ;;  %v1428_v18 = vld [vmem:[%s2090_s2 + $0x8] sm:$0xff]  ;;  %v836_v14 = vmul.f32 %v834_v8, %v829_v59 }
 0x1b2   :  { %v805_v40 = vadd.f32 %v803_v36, %v789_v13 }
 0x1b3   :  { %v797_v17 = vpop.permute.xlu1 %796  ;;  %v857_v19 = vpop.permute.xlu0 %856 }
 0x1b4   :  { %v804_v26 = vmul.f32 %v802_v56, %v797_v17  ;;  %1405 = vset.pattern.permute.xlu1 %v1463_v15  ;;  %v821_v29 = vadd.f32 %v819_v43, %v805_v40  ;;  %v930_v56 = vrot.slane %v2007_v34, %v1784_v32 }
 0x1b5   :  { %1125 = vperm.xlu1 %1405, %v1869_v25  }
 0x1b6   :  { %v806_v39 = vadd.f32 %v804_v26, %v790_v21 }
 0x1b7   :  { %v905_v55 = vpop.permute.xlu0 %904 }
 0x1b8   :  { %v813_v4 = vpop.permute.xlu1 %812 }
 0x1b9   :  { %v820_v48 = vmul.f32 %v818_v38, %v813_v4  ;;  %1407 = vset.pattern.permute.xlu1 %v1456_v0  ;;  %v866_v0 = vrot.slane %v2007_v34, %v1698_v58  ;;  %v2041_v38 = vmax.f32 %v559_v45, 0.0 }
 0x1ba   :  { %1084 = vperm.xlu1 %1407, %v1428_v18  }
 0x1bb   :  { %v822_v35 = vadd.f32 %v820_v48, %v806_v39  ;;  %v867_v33 = vmul.f32 %v866_v0, %v857_v19  ;;  %v953_v5 = vpop.permute.xlu0 %952  ;;  %v962_v2 = vrot.slane %v2041_v38, %v1663_v41  ;;  %v1010_v19 = vrot.slane %v2041_v38, %v1703_v61 }
 0x1bd   :  { %v825_v54 = vpop.permute.xlu1 %824  ;;  %v838_v50 = vadd.f32 %v836_v14, %v822_v35 }
 0x1be   :  { %v835_v9 = vmul.f32 %v834_v8, %v825_v54  ;;  %1408 = vset.pattern.permute.xlu1 %v1458_v6  ;;  %v994_v54 = vrot.slane %v2041_v38, %v1698_v58 }
 0x1bf   :  { %1145 = vperm.xlu1 %1408, %v1869_v25   ;;  %v877_v21 = vpop.permute.xlu0 %876 }
 0x1c0   :  { %v837_v1 = vadd.f32 %v835_v9, %v821_v29  ;;  %v963_v29 = vmul.f32 %v962_v2, %v953_v5 }
 0x1c2   :  { %v841_v49 = vpop.permute.xlu1 %840 }
 0x1c3   :  { %v851_v28 = vmul.f32 %v850_v27, %v841_v49  ;;  %1410 = vset.pattern.permute.xlu1 %v1466_v20  ;;  %v925_v37 = vpop.permute.xlu0 %924 }
 0x1c4   :  { %1165 = vperm.xlu1 %1410, %v1869_v25  }
 0x1c5   :  { %v853_v53 = vadd.f32 %v851_v28, %v837_v1 }
 0x1c6   :  { %v845_v6 = vpop.permute.xlu1 %844 }
 0x1c7   :  { %v852_v23 = vmul.f32 %v850_v27, %v845_v6  ;;  %v869_v62 = vadd.f32 %v867_v33, %v853_v53  ;;  %v1049_v17 = vpop.permute.xlu0 %1048  ;;  %v932_v6 = vmul.f32 %v930_v56, %v925_v37  ;;  %v1074_v37 = vrot.slane %v2041_v38, %v1823_v47 }
 0x1c8   :  { %1411 = vset.pattern.permute.xlu1 %v1460_v10  ;;  %v914_v10 = vrot.slane %v2007_v34, %v1762_v44 }
 0x1c9   :  { %v854_v60 = vadd.f32 %v852_v23, %v838_v50  ;;  %1175 = vperm.xlu1 %1411, %v1869_v25  }
 0x1cb   :  { %v873_v24 = vpop.permute.xlu1 %872  ;;  %v973_v48 = vpop.permute.xlu0 %972 }
 0x1cc   :  { %v883_v3 = vmul.f32 %v882_v30, %v873_v24 }
 0x1cd   :  { %1413 = vset.pattern.permute.xlu1 %v1468_v22  ;;  %v915_v22 = vmul.f32 %v914_v10, %v905_v55 }
 0x1ce   :  { %v885_v20 = vadd.f32 %v883_v3, %v869_v62  ;;  %1195 = vperm.xlu1 %1413, %v1869_v25   ;;  %v1026_v62 = vrot.slane %v2041_v38, %v1730_v52  ;;  %v1042_v3 = vrot.slane %v2041_v38, %v1762_v44 }
 0x1cf   :  { %v1001_v50 = vpop.permute.xlu0 %1000 }
 0x1d0   :  { %v889_v63 = vpop.permute.xlu1 %888  ;;  %v1011_v1 = vmul.f32 %v1010_v19, %v1001_v50 }
 0x1d1   :  { %v899_v16 = vmul.f32 %v898_v31, %v889_v63  ;;  %v1058_v63 = vrot.slane %v2041_v38, %v1784_v32 }
 0x1d2   :  { %1414 = vset.pattern.permute.xlu1 %v1461_v11  ;;  %v946_v11 = vrot.slane %v2007_v34, %v1823_v47  ;;  %v884_v34 = vmul.f32 %v882_v30, %v877_v21 }
 0x1d3   :  { %v901_v13 = vadd.f32 %v899_v16, %v885_v20  ;;  %1205 = vperm.xlu1 %1414, %v1869_v25   ;;  %v1059_v45 = vmul.f32 %v1058_v63, %v1049_v17 }
 0x1d5   :  { %v921_v51 = vpop.permute.xlu1 %920  ;;  %v917_v57 = vadd.f32 %v915_v22, %v901_v13 }
 0x1d6   :  { %v931_v36 = vmul.f32 %v930_v56, %v921_v51 }
 0x1d7   :  { %1416 = vset.pattern.permute.xlu1 %v2109_v7  ;;  %v1093_v7 = vld [vmem:[%s2090_s2] sm:$0xf] }
 0x1d8   :  { %v933_v12 = vadd.f32 %v931_v36, %v917_v57  ;;  %1225 = vperm.xlu1 %1416, %v1869_v25  }
 0x1da   :  { %v937_v40 = vpop.permute.xlu1 %936 }
 0x1db   :  { %v947_v43 = vmul.f32 %v946_v11, %v937_v40 }
 0x1dc   :  { %1417 = vset.pattern.permute.xlu1 %v2111_v46  ;;  %v978_v46 = vrot.slane %v2041_v38, %v1666_v42 }
 0x1dd   :  { %v949_v26 = vadd.f32 %v947_v43, %v933_v12  ;;  %1235 = vperm.xlu1 %1417, %v1869_v25  }
 0x1de   :  { %v980_v57 = vmul.f32 %v978_v46, %v973_v48 }
 0x1df   :  { %v861_v39 = vpop.permute.xlu1 %860  ;;  %v965_v8 = vadd.f32 %v963_v29, %v949_v26  ;;  %v1005_v29 = vpop.permute.xlu0 %1004 }
 0x1e0   :  { %v868_v4 = vmul.f32 %v866_v0, %v861_v39  ;;  %v1012_v17 = vmul.f32 %v1010_v19, %v1005_v29 }
 0x1e1   :  { %1419 = vset.pattern.permute.xlu1 %v1463_v15 }
 0x1e2   :  { %v870_v59 = vadd.f32 %v868_v4, %v854_v60  ;;  %1256 = vperm.xlu1 %1419, %v1093_v7  }
 0x1e4   :  { %v969_v18 = vpop.permute.xlu1 %968  ;;  %v886_v35 = vadd.f32 %v884_v34, %v870_v59 }
 0x1e5   :  { %v979_v25 = vmul.f32 %v978_v46, %v969_v18 }
 0x1e7   :  { %v981_v14 = vadd.f32 %v979_v25, %v965_v8 }
 0x1e9   :  { %v985_v9 = vpop.permute.xlu1 %984 }
 0x1ea   :  { %v995_v15 = vmul.f32 %v994_v54, %v985_v9 }
 0x1ec   :  { %v997_v27 = vadd.f32 %v995_v15, %v981_v14  ;;  %v1097_v15 = vpop.permute.xlu0 %1096 }
 0x1ee   :  { %v893_v0 = vpop.permute.xlu1 %892  ;;  %v1013_v49 = vadd.f32 %v1011_v1, %v997_v27 }
 0x1ef   :  { %v900_v28 = vmul.f32 %v898_v31, %v893_v0 }
 0x1f1   :  { %v902_v55 = vadd.f32 %v900_v28, %v886_v35 }
 0x1f3   :  { %v909_v53 = vpop.permute.xlu1 %908 }
 0x1f4   :  { %v916_v33 = vmul.f32 %v914_v10, %v909_v53  ;;  %v1116_v53 = vpop.permute.xlu0 %1115 }
 0x1f6   :  { %v918_v23 = vadd.f32 %v916_v33, %v902_v55 }
 0x1f8   :  { %v1017_v60 = vpop.permute.xlu1 %1016  ;;  %v934_v30 = vadd.f32 %v932_v6, %v918_v23 }
 0x1f9   :  { %v1027_v5 = vmul.f32 %v1026_v62, %v1017_v60 }
 0x1fb   :  { %v1029_v24 = vadd.f32 %v1027_v5, %v1013_v49 }
 0x1fd   :  { %v1033_v20 = vpop.permute.xlu1 %1032 }
 0x1fe   :  { %v1043_v31 = vmul.f32 %v1042_v3, %v1033_v20 }
 0x200   :  { %v1045_v21 = vadd.f32 %v1043_v31, %v1029_v24 }
 0x202   :  { %v941_v10 = vpop.permute.xlu1 %940  ;;  %v1061_v16 = vadd.f32 %v1059_v45, %v1045_v21 }
 0x203   :  { %v948_v13 = vmul.f32 %v946_v11, %v941_v10 }
 0x205   :  { %v950_v22 = vadd.f32 %v948_v13, %v934_v30 }
 0x207   :  { %v957_v56 = vpop.permute.xlu1 %956 }
 0x208   :  { %v964_v51 = vmul.f32 %v962_v2, %v957_v56 }
 0x20a   :  { %v966_v36 = vadd.f32 %v964_v51, %v950_v22 }
 0x20c   :  { %v1065_v12 = vpop.permute.xlu1 %1064  ;;  %v982_v40 = vadd.f32 %v980_v57, %v966_v36 }
 0x20d   :  { %v1075_v43 = vmul.f32 %v1074_v37, %v1065_v12 }
 0x20f   :  { %v1077_v26 = vadd.f32 %v1075_v43, %v1061_v16 }
 0x211   :  { %v989_v39 = vpop.permute.xlu1 %988 }
 0x212   :  { %v996_v7 = vmul.f32 %v994_v54, %v989_v39 }
 0x214   :  { %v998_v8 = vadd.f32 %v996_v7, %v982_v40 }
 0x216   :  { %v1081_v4 = vpop.permute.xlu1 %1080  ;;  %v1014_v34 = vadd.f32 %v1012_v17, %v998_v8 }
 0x217   :  { %v1087_v25 = vadd.f32 %v1081_v4, %v1077_v26 }
 0x219   :  { %v1089_v14 = vmax.f32 %v1087_v25, 0.0 }
 0x21b   :  { %v1021_v11 = vpop.permute.xlu1 %1020  ;;  %v1102_v1 = vrot.slane %v1089_v14, %v1663_v41  ;;  %v1111_v54 = vrot.slane %v1089_v14, %v1666_v42  ;;  %v1121_v55 = vrot.slane %v1089_v14, %v1698_v58  ;;  %v1131_v23 = vrot.slane %v1089_v14, %v1703_v61 }
 0x21c   :  { %v1028_v59 = vmul.f32 %v1026_v62, %v1021_v11  ;;  %v1141_v30 = vrot.slane %v1089_v14, %v1730_v52  ;;  %v1151_v31 = vrot.slane %v1089_v14, %v1762_v44  ;;  %v1161_v21 = vrot.slane %v1089_v14, %v1784_v32 }
 0x21d   :  { %v1103_v28 = vmul.f32 %v1102_v1, %v1097_v15  ;;  %v1122_v62 = vmul.f32 %v1121_v55, %v1116_v53 }
 0x21e   :  { %v1030_v18 = vadd.f32 %v1028_v59, %v1014_v34 }
 0x220   :  { %v1037_v2 = vpop.permute.xlu1 %1036 }
 0x221   :  { %v1044_v48 = vmul.f32 %v1042_v3, %v1037_v2  ;;  %v1136_v3 = vpop.permute.xlu0 %1135 }
 0x223   :  { %v1046_v46 = vadd.f32 %v1044_v48, %v1030_v18 }
 0x225   :  { %v1106_v35 = vpop.permute.xlu1 %1105  ;;  %v1156_v22 = vpop.permute.xlu0 %1155 }
 0x226   :  { %v1112_v0 = vmul.f32 %v1111_v54, %v1106_v35  ;;  %v1162_v51 = vmul.f32 %v1161_v21, %v1156_v22 }
 0x228   :  { %v1113_v6 = vadd.f32 %v1112_v0, %v1103_v28 }
 0x229   :  { %v1186_v17 = vpop.permute.xlu0 %1185 }
 0x22a   :  { %v1053_v38 = vpop.permute.xlu1 %1052  ;;  %v1123_v5 = vadd.f32 %v1122_v62, %v1113_v6 }
 0x22b   :  { %v1060_v50 = vmul.f32 %v1058_v63, %v1053_v38  ;;  %v1142_v63 = vmul.f32 %v1141_v30, %v1136_v3 }
 0x22d   :  { %v1062_v9 = vadd.f32 %v1060_v50, %v1046_v46  ;;  %v1216_v25 = vpop.permute.xlu0 %1215 }
 0x22f   :  { %v1069_v19 = vpop.permute.xlu1 %1068 }
 0x230   :  { %v1076_v27 = vmul.f32 %v1074_v37, %v1069_v19  ;;  %v1171_v37 = vrot.slane %v1089_v14, %v1823_v47 }
 0x231   :  { %v1246_v19 = vpop.permute.xlu0 %1245 }
 0x232   :  { %v1078_v49 = vadd.f32 %v1076_v27, %v1062_v9 }
 0x234   :  { %v1126_v33 = vpop.permute.xlu1 %1125 }
 0x235   :  { %v1132_v60 = vmul.f32 %v1131_v23, %v1126_v33 }
 0x237   :  { %v1133_v20 = vadd.f32 %v1132_v60, %v1123_v5 }
 0x239   :  { %v1085_v24 = vpop.permute.xlu1 %1084  ;;  %v1143_v16 = vadd.f32 %v1142_v63, %v1133_v20 }
 0x23a   :  { %v1088_v10 = vadd.f32 %v1085_v24, %v1078_v49 }
 0x23c   :  { %v1090_v57 = vmax.f32 %v1088_v10, 0.0 }
 0x23e   :  { %v1146_v45 = vpop.permute.xlu1 %1145  ;;  %v1181_v43 = vrot.slane %v1090_v57, %v1663_v41  ;;  %v1191_v26 = vrot.slane %v1090_v57, %v1666_v42  ;;  %v1201_v34 = vrot.slane %v1090_v57, %v1698_v58  ;;  %v1221_v48 = vrot.slane %v1090_v57, %v1730_v52 }
 0x23f   :  { %v1152_v13 = vmul.f32 %v1151_v31, %v1146_v45  ;;  %v1211_v46 = vrot.slane %v1090_v57, %v1703_v61  ;;  %v1231_v14 = vrot.slane %v1090_v57, %v1762_v44  ;;  %v1251_v58 = vrot.slane %v1090_v57, %v1823_v47 }
 0x240   :  { %v1192_v4 = vmul.f32 %v1191_v26, %v1186_v17  ;;  %v1222_v42 = vmul.f32 %v1221_v48, %v1216_v25  ;;  %v1241_v54 = vrot.slane %v1090_v57, %v1784_v32 }
 0x241   :  { %v1153_v56 = vadd.f32 %v1152_v13, %v1143_v16  ;;  %v1252_v0 = vmul.f32 %v1251_v58, %v1246_v19 }
 0x243   :  { %v1166_v36 = vpop.permute.xlu1 %1165  ;;  %v1163_v12 = vadd.f32 %v1162_v51, %v1153_v56 }
 0x244   :  { %v1172_v40 = vmul.f32 %v1171_v37, %v1166_v36 }
 0x246   :  { %v1173_v39 = vadd.f32 %v1172_v40, %v1163_v12 }
 0x248   :  { %v1176_v29 = vpop.permute.xlu1 %1175 }
 0x249   :  { %v1182_v7 = vmul.f32 %v1181_v43, %v1176_v29 }
 0x24b   :  { %v1183_v8 = vadd.f32 %v1182_v7, %v1173_v39 }
 0x24d   :  { %v1196_v11 = vpop.permute.xlu1 %1195  ;;  %v1193_v59 = vadd.f32 %v1192_v4, %v1183_v8 }
 0x24e   :  { %v1202_v18 = vmul.f32 %v1201_v34, %v1196_v11 }
 0x250   :  { %v1203_v2 = vadd.f32 %v1202_v18, %v1193_v59 }
 0x252   :  { %v1206_v35 = vpop.permute.xlu1 %1205 }
 0x253   :  { %v1212_v41 = vmul.f32 %v1211_v46, %v1206_v35 }
 0x255   :  { %v1213_v38 = vadd.f32 %v1212_v41, %v1203_v2 }
 0x257   :  { %v1226_v50 = vpop.permute.xlu1 %1225  ;;  %v1223_v9 = vadd.f32 %v1222_v42, %v1213_v38 }
 0x258   :  { %v1232_v15 = vmul.f32 %v1231_v14, %v1226_v50 }
 0x25a   :  { %v1233_v1 = vadd.f32 %v1232_v15, %v1223_v9 }
 0x25c   :  { %v1236_v27 = vpop.permute.xlu1 %1235 }
 0x25d   :  { %v1242_v52 = vmul.f32 %v1241_v54, %v1236_v27 }
 0x25f   :  { %v1243_v61 = vadd.f32 %v1242_v52, %v1233_v1 }
 0x261   :  { %v1257_v49 = vpop.permute.xlu1 %1256  ;;  %v1253_v28 = vadd.f32 %v1252_v0, %v1243_v61 }
 0x263   :  { %v1259_v55 = vadd.f32 %v1257_v49, %v1253_v28 }
 0x265   :  { %v1261_v53 = vsel %vm1260_vm0, %v1259_v55, -inf }
 0x266   :  { %v1262_v33 = vrot.slane %v1261_v53, 4 }
 0x268   :  { %v1263_v44 = vmax.f32 %v1261_v53, %v1262_v33 }
 0x26a   :  { %v1264_v6 = vrot.slane %v1263_v44, 2 }
 0x26c   :  { %v1265_v23 = vmax.f32 %v1263_v44, %v1264_v6 }
 0x26e   :  { %v1266_v62 = vrot.slane %v1265_v23, 1 }
 0x270   :  { %v1267_v60 = vmax.f32 %v1265_v23, %v1266_v62 }
 0x272   :  { %v1268_v30 = vsub.f32 %v1259_v55, %v1267_v60 }
 0x274   :  { %v1269_v47 = vmul.f32 1.442695, %v1268_v30 }
 0x276   :  { %1421 = vpow2.f32 %v1269_v47 }
 0x280   :  { %v1422_v32 = vpop.eup %1421 }
 0x281   :  { %v1271_v5 = vsel %vm1260_vm0, %v1422_v32, 0.0 }
 0x282   :  { %v1272_v24 = vrot.slane %v1271_v5, 4 }
 0x284   :  { %v1273_v3 = vadd.f32 %v1272_v24, %v1271_v5 }
 0x286   :  { %v1274_v20 = vrot.slane %v1273_v3, 2 }
 0x288   :  { %v1275_v63 = vadd.f32 %v1274_v20, %v1273_v3 }
 0x28a   :  { %v1276_v31 = vrot.slane %v1275_v63, 1 }
 0x28c   :  { %v1277_v45 = vadd.f32 %v1276_v31, %v1275_v63 }
 0x28e   :  { %1423 = vrcp.f32 %v1277_v45 }
 0x298   :  { %v1424_v21 = vpop.eup %1423 }
 0x299   :  { %v1279_v10 = vmul.f32 %v1424_v21, %v1422_v32 }
 0x29b   :  { %1280 = vst [vmem:[%s2091_s3] sm:$0xf] %v1279_v10 }
 0x29c   :  { %1285 = vsyncpa [#allocation3], 1 }

</bundles_post_ra>
